<compile_context>
chip_gen: v7x
topology: tpu7x:2x2x1
jax: 0.10.0
libtpu: 0.0.40
codegen_flags: <defaults>
</compile_context>

<pallas_src>
import math
import functools

import jax
import jax.numpy as jnp
from jax import lax
from jax.experimental import pallas as pl
from jax.experimental.pallas import tpu as pltpu


def _round_up(n, m):
    return ((n + m - 1) // m) * m


# ----------------------------------------------------------------------------
# Pallas kernel: fused bidirectional LSTM recurrence + slot / intent heads
# ----------------------------------------------------------------------------
def _bilstm_ias_kernel(mask2_ref,      # (S*B, 2H) f32 {0,1}: [mask(t) | mask(S-1-t)]
                       x2_ref,         # (S*B, 2E) f32: [emb(t) | emb(S-1-t)] time-major
                       wih_ref,        # (2E, 8H) f32, gate-interleaved block-diag (g cols x2)
                       whh_ref,        # (2H, 8H) f32, gate-interleaved block-diag (g cols x2)
                       b_ref,          # (1, 8H)  f32 fused bias (g entries x2)
                       wslot_ref,      # (2H, Osp) f32
                       bslot_ref,      # (1, Osp)  f32
                       wint_ref,       # (2H, Oi)  f32
                       bint_ref,       # (1, Oi)   f32
                       slots_ref,      # out: (S*B, Osp) f32
                       intent_ref,     # out: (B, Oi)    f32
                       *, batch, hid):
    B = batch
    H = hid
    H2 = 2 * H
    H6 = 6 * H
    H8 = 8 * H
    SB = x2_ref.shape[0]
    S = SB // B

    # ---- One hoisted input projection for both directions, bias fused ----
    xg = jnp.dot(x2_ref[...], wih_ref[...],
                 preferred_element_type=jnp.float32) + b_ref[...]        # (S*B, 8H)
    whh = whh_ref[...]                                                    # (2H, 8H)
    mask2 = mask2_ref[...]                                                # (S*B, 2H)

    # Constant lane selector: columns [6H, 8H) hold the (pre-scaled-by-2) g gates.
    col = lax.broadcasted_iota(jnp.int32, (B, H8), 1)
    is_g = col >= H6

    # ---- Fused fwd/bwd recurrence, fully unrolled (S static & small).  States live in
    #      registers; per-step outputs are collected and bulk-consumed after the loop. ----
    h = jnp.zeros((B, H2), jnp.float32)   # [h_fwd | h_bwd]
    c = jnp.zeros((B, H2), jnp.float32)
    houts = []
    for s in range(S):
        pre = xg[s * B:(s + 1) * B, :]                                   # (B, 8H)
        m = mask2[s * B:(s + 1) * B, :]                                  # (B, 2H)
        gates = pre + jnp.dot(h, whh, preferred_element_type=jnp.float32)
        sig = jax.nn.sigmoid(gates)                                      # one EUP pass, full reg
        act = jnp.where(is_g, 2.0 * sig - 1.0, sig)                      # tanh(z) = 2*sig(2z)-1
        i_g = act[:, :H2]
        f_g = act[:, H2:2 * H2]
        o_g = act[:, 2 * H2:3 * H2]
        g_g = act[:, 3 * H2:]
        c_new = f_g * c + i_g * g_g
        h_new = o_g * jnp.tanh(c_new)
        h_out = m * h_new                     # pad_packed_sequence: zeros past seq_len
        h = h + m * (h_new - h)               # state frozen past seq_len (m in {0,1} -> exact)
        c = c + m * (c_new - c)
        houts.append(h_out)

    # ---- Assemble hidden states in time order: fwd half of step t, bwd half of step S-1-t ----
    hs_all = jnp.concatenate(
        [jnp.concatenate([houts[t][:, :H], houts[S - 1 - t][:, H:]], axis=1)
         for t in range(S)], axis=0)                                     # (S*B, 2H)

    # ---- Single slot-head matmul (lane-dense padded output) ----
    slots_ref[...] = (jnp.dot(hs_all, wslot_ref[...],
                              preferred_element_type=jnp.float32) + bslot_ref[...])

    # ---- Intent head on the final (frozen) hidden states: cat(h_fwd_last, h_bwd_last) ----
    intent_ref[...] = (jnp.dot(h, wint_ref[...],
                               preferred_element_type=jnp.float32) + bint_ref[...])


# ----------------------------------------------------------------------------
# Wrapper: parameter re-layout + pallas_call
# ----------------------------------------------------------------------------
def _dir_gate_parts(w_ih, w_hh, b_ih, b_hh, H):
    """Split PyTorch (i,f,g,o) row blocks, transpose, reorder to (i,f,o,g) and pre-scale g by 2
    (so the kernel can use one full-register sigmoid and recover tanh as 2*sigmoid(2x)-1)."""
    def split4(w):
        return w[0:H], w[H:2 * H], w[2 * H:3 * H], w[3 * H:4 * H]
    ii, ff, gg, oo = split4(w_ih)
    ih = (ii.T, ff.T, oo.T, 2.0 * gg.T)            # each (E, H)
    ii, ff, gg, oo = split4(w_hh)
    hh = (ii.T, ff.T, oo.T, 2.0 * gg.T)            # each (H, H)
    b = b_ih + b_hh
    bi, bf, bg, bo = b[0:H], b[H:2 * H], b[2 * H:3 * H], b[3 * H:4 * H]
    bb = (bi, bf, bo, 2.0 * bg)                    # each (H,)
    return ih, hh, bb


def _interleave_blockdiag(parts_f, parts_b):
    """Per gate g: [[fwd_g, 0], [0, bwd_g]] stacked on rows, gates concatenated on columns.
    Column layout: [i_f,i_b, f_f,f_b, o_f,o_b, g_f,g_b], each H wide."""
    blocks = []
    for pf, pb in zip(parts_f, parts_b):
        top = jnp.concatenate([pf, jnp.zeros_like(pb)], axis=1)
        bot = jnp.concatenate([jnp.zeros_like(pf), pb], axis=1)
        blocks.append(jnp.concatenate([top, bot], axis=0))
    return jnp.concatenate(blocks, axis=1)


def do_model_ias_forward(params, utterance, seq_lengths):
    """Returns (slots: (B, out_slot, S), intent: (B, out_int)) — PyTorch convention."""
    emb = params["embedding"][utterance].astype(jnp.float32)   # (B, S, E) gather (glue)
    B, S, E = emb.shape
    H = params["weight_hh_l0"].shape[1]
    out_slot = params["slot_w"].shape[0]
    out_int = params["intent_w"].shape[0]
    Osp = _round_up(out_slot, 128)                             # lane-dense slot head

    # Inputs for the fused-direction cell: row s*B+b holds [emb(b, s), emb(b, S-1-s)].
    x_f = jnp.transpose(emb, (1, 0, 2)).reshape(S * B, E)
    x_b = jnp.transpose(emb[:, ::-1, :], (1, 0, 2)).reshape(S * B, E)
    x2 = jnp.concatenate([x_f, x_b], axis=1)                   # (S*B, 2E)

    # Validity mask, pre-broadcast: cols [0,H) gate time s, cols [H,2H) gate time S-1-s.
    lens = seq_lengths.astype(jnp.int32)
    t = jnp.arange(S, dtype=jnp.int32)[:, None]                # (S, 1)
    m_f = (t < lens[None, :]).astype(jnp.float32)              # (S, B)
    m_b = ((S - 1 - t) < lens[None, :]).astype(jnp.float32)    # (S, B)
    mask2 = jnp.concatenate(
        [jnp.broadcast_to(m_f[:, :, None], (S, B, H)),
         jnp.broadcast_to(m_b[:, :, None], (S, B, H))], axis=2).reshape(S * B, 2 * H)

    # Fused-direction weights (gate-interleaved block-diagonal layout).
    ih_f, hh_f, bb_f = _dir_gate_parts(params["weight_ih_l0"], params["weight_hh_l0"],
                                       params["bias_ih_l0"], params["bias_hh_l0"], H)
    ih_b, hh_b, bb_b = _dir_gate_parts(params["weight_ih_l0_reverse"],
                                       params["weight_hh_l0_reverse"],
                                       params["bias_ih_l0_reverse"],
                                       params["bias_hh_l0_reverse"], H)
    wih_all = _interleave_blockdiag(ih_f, ih_b)                # (2E, 8H)
    whh_all = _interleave_blockdiag(hh_f, hh_b)                # (2H, 8H)
    b_all = jnp.concatenate(
        [jnp.concatenate([bf, bb]) for bf, bb in zip(bb_f, bb_b)])[None, :]   # (1, 8H)

    # Heads: slot head padded to a lane-dense 128 multiple; intent head kept unpadded (trim).
    wslot_all = jnp.pad(params["slot_w"].T, ((0, 0), (0, Osp - out_slot)))    # (2H, Osp)
    bslot = jnp.pad(params["slot_b"], (0, Osp - out_slot))[None, :]           # (1, Osp)
    wint_all = params["intent_w"].T                                           # (2H, Oi)
    bint = params["intent_b"][None, :]                                        # (1, Oi)

    vmem = pl.BlockSpec(memory_space=pltpu.MemorySpace.VMEM)

    slots_flat, intent = pl.pallas_call(
        functools.partial(_bilstm_ias_kernel, batch=B, hid=H),
        out_shape=(jax.ShapeDtypeStruct((S * B, Osp), jnp.float32),
                   jax.ShapeDtypeStruct((B, out_int), jnp.float32)),
        in_specs=[vmem] * 9,
        out_specs=(vmem, vmem),
    )(mask2, x2, wih_all, whh_all, b_all, wslot_all, bslot, wint_all, bint)

    slots = slots_flat[:, :out_slot].reshape(S, B, out_slot)   # drop lane padding
    slots = jnp.transpose(slots, (1, 2, 0))                    # (B, out_slot, S)
    return slots, intent


# ----------------------------------------------------------------------------
# Pure-JAX reference (mirrors the PyTorch forward, eval-mode dropout)
# ----------------------------------------------------------------------------
def reference_forward(params, utterance, seq_lengths):
    emb = params["embedding"][utterance].astype(jnp.float32)   # (B, S, E)
    B, S, E = emb.shape
    H = params["weight_hh_l0"].shape[1]

    def run_dir(w_ih, w_hh, b_ih, b_hh, reverse):
        h = jnp.zeros((B, H), jnp.float32)
        c = jnp.zeros((B, H), jnp.float32)
        out = [None] * S
        order = range(S - 1, -1, -1) if reverse else range(S)
        for t in order:
            x_t = emb[:, t, :]
            gates = x_t @ w_ih.T + h @ w_hh.T + b_ih + b_hh
            i = jax.nn.sigmoid(gates[:, :H])
            f = jax.nn.sigmoid(gates[:, H:2 * H])
            g = jnp.tanh(gates[:, 2 * H:3 * H])
            o = jax.nn.sigmoid(gates[:, 3 * H:])
            c_new = f * c + i * g
            h_new = o * jnp.tanh(c_new)
            mask = (t < seq_lengths)[:, None]
            h = jnp.where(mask, h_new, h)
            c = jnp.where(mask, c_new, c)
            out[t] = jnp.where(mask, h_new, 0.0)
        return jnp.stack(out, axis=1), h                       # (B,S,H), (B,H)

    out_f, hf = run_dir(params["weight_ih_l0"], params["weight_hh_l0"],
                        params["bias_ih_l0"], params["bias_hh_l0"], reverse=False)
    out_b, hb = run_dir(params["weight_ih_l0_reverse"], params["weight_hh_l0_reverse"],
                        params["bias_ih_l0_reverse"], params["bias_hh_l0_reverse"], reverse=True)
    enc = jnp.concatenate([out_f, out_b], axis=-1)             # (B, S, 2H)
    slots = enc @ params["slot_w"].T + params["slot_b"]        # (B, S, out_slot)
    last = jnp.concatenate([hf, hb], axis=-1)                  # (B, 2H)
    intent = last @ params["intent_w"].T + params["intent_b"]
    return jnp.transpose(slots, (0, 2, 1)), intent


# ----------------------------------------------------------------------------
# Deterministic parameter init (shapes follow DoModelIAS.__init__)
# ----------------------------------------------------------------------------
def init_params(key, vocab_len, emb_size, hid_size, out_slot, out_int, pad_index=0):
    ks = jax.random.split(key, 16)
    H, E = hid_size, emb_size
    s_lstm = 1.0 / math.sqrt(H)

    def u(k, shape, s):
        return jax.random.uniform(k, shape, jnp.float32, -s, s)

    emb = jax.random.normal(ks[0], (vocab_len, E), jnp.float32) * 0.1
    emb = emb.at[pad_index].set(0.0)                           # padding_idx row = 0

    params = {
        "embedding": emb,
        "weight_ih_l0": u(ks[1], (4 * H, E), s_lstm),
        "weight_hh_l0": u(ks[2], (4 * H, H), s_lstm),
        "bias_ih_l0": u(ks[3], (4 * H,), s_lstm),
        "bias_hh_l0": u(ks[4], (4 * H,), s_lstm),
        "weight_ih_l0_reverse": u(ks[5], (4 * H, E), s_lstm),
        "weight_hh_l0_reverse": u(ks[6], (4 * H, H), s_lstm),
        "bias_ih_l0_reverse": u(ks[7], (4 * H,), s_lstm),
        "bias_hh_l0_reverse": u(ks[8], (4 * H,), s_lstm),
        "slot_w": u(ks[9], (out_slot, 2 * H), 1.0 / math.sqrt(2 * H)),
        "slot_b": u(ks[10], (out_slot,), 1.0 / math.sqrt(2 * H)),
        "intent_w": u(ks[11], (out_int, 2 * H), 1.0 / math.sqrt(2 * H)),
        "intent_b": u(ks[12], (out_int,), 1.0 / math.sqrt(2 * H)),
    }
    return params


if __name__ == "__main__":
    # small shapes consistent with the module's forward
    B, S = 2, 8
    vocab_len, emb_size, hid_size = 50, 32, 32
    out_slot, out_int, pad_index = 16, 8, 0

    key = jax.random.PRNGKey(0)
    k_par, k_tok = jax.random.split(key)
    params = init_params(k_par, vocab_len, emb_size, hid_size, out_slot, out_int, pad_index)

    seq_lengths = jnp.array([8, 5], dtype=jnp.int32)           # max length == S
    tokens = jax.random.randint(k_tok, (B, S), 1, vocab_len, dtype=jnp.int32)
    pos = jnp.arange(S)[None, :]
    utterance = jnp.where(pos < seq_lengths[:, None], tokens, pad_index)  # pad past length

    fwd = jax.jit(functools.partial(do_model_ias_forward, params))
    slots, intent = fwd(utterance, seq_lengths)
    jax.block_until_ready((slots, intent))

    slots_ref, intent_ref = reference_forward(params, utterance, seq_lengths)

    assert slots.shape == (B, out_slot, S), slots.shape
    assert intent.shape == (B, out_int), intent.shape
    assert jnp.allclose(slots, slots_ref, atol=1e-2, rtol=1e-2), "slot logits mismatch"
    assert jnp.allclose(intent, intent_ref, atol=1e-2, rtol=1e-2), "intent logits mismatch"

    # TODO(synk): dropout is stochastic in training mode; implemented as eval-mode identity.
    print("KERNEL_OK")
</pallas_src>

<mosaic_0001>
module attributes {stable_mosaic.version = 11 : i64} {
  func.func @_bilstm_ias_kernel(%arg0: memref<16x64xf32, #tpu.memory_space<vmem>>, %arg1: memref<16x64xf32, #tpu.memory_space<vmem>>, %arg2: memref<64x256xf32, #tpu.memory_space<vmem>>, %arg3: memref<64x256xf32, #tpu.memory_space<vmem>>, %arg4: memref<1x256xf32, #tpu.memory_space<vmem>>, %arg5: memref<64x128xf32, #tpu.memory_space<vmem>>, %arg6: memref<1x128xf32, #tpu.memory_space<vmem>>, %arg7: memref<64x8xf32, #tpu.memory_space<vmem>>, %arg8: memref<1x8xf32, #tpu.memory_space<vmem>>, %arg9: memref<16x128xf32, #tpu.memory_space<vmem>>, %arg10: memref<2x8xf32, #tpu.memory_space<vmem>>) attributes {dimension_semantics = [], scalar_prefetch = 0 : i64, scratch_operands = 0 : i64, tpu.core_type = #tpu.core_type<tc>} {
    %c0 = arith.constant 0 : index
    %c0_0 = arith.constant 0 : index
    %0 = vector.load %arg1[%c0, %c0_0] : memref<16x64xf32, #tpu.memory_space<vmem>>, vector<16x64xf32>
    %c0_1 = arith.constant 0 : index
    %c0_2 = arith.constant 0 : index
    %1 = vector.load %arg2[%c0_1, %c0_2] : memref<64x256xf32, #tpu.memory_space<vmem>>, vector<64x256xf32>
    %cst = arith.constant dense<0.000000e+00> : vector<16x256xf32>
    %2 = tpu.matmul %0, %1, %cst {dimension_numbers = #tpu.dot_dimension_numbers<[1], [0], [0], [1], [0, 0, 1, 1], [], []>} : vector<16x64xf32>, vector<64x256xf32>, vector<16x256xf32> -> vector<16x256xf32>
    %c0_3 = arith.constant 0 : index
    %c0_4 = arith.constant 0 : index
    %3 = vector.load %arg4[%c0_3, %c0_4] : memref<1x256xf32, #tpu.memory_space<vmem>>, vector<1x256xf32>
    %4 = vector.broadcast %3 : vector<1x256xf32> to vector<16x256xf32>
    %5 = arith.addf %2, %4 : vector<16x256xf32>
    %c0_5 = arith.constant 0 : index
    %c0_6 = arith.constant 0 : index
    %6 = vector.load %arg3[%c0_5, %c0_6] : memref<64x256xf32, #tpu.memory_space<vmem>>, vector<64x256xf32>
    %c0_7 = arith.constant 0 : index
    %c0_8 = arith.constant 0 : index
    %7 = vector.load %arg0[%c0_7, %c0_8] : memref<16x64xf32, #tpu.memory_space<vmem>>, vector<16x64xf32>
    %8 = tpu.iota {dimensions = array<i32: 1>} : vector<2x256xi32>
    %c192_i32 = arith.constant 192 : i32
    %9 = vector.broadcast %c192_i32 : i32 to vector<2x256xi32>
    %10 = arith.cmpi sge, %8, %9 : vector<2x256xi32>
    %cst_9 = arith.constant 0.000000e+00 : f32
    %11 = vector.broadcast %cst_9 : f32 to vector<2x64xf32>
    %cst_10 = arith.constant 0.000000e+00 : f32
    %12 = vector.broadcast %cst_10 : f32 to vector<2x64xf32>
    %13 = vector.extract_strided_slice %5 {offsets = [0, 0], sizes = [2, 256], strides = [1, 1]} : vector<16x256xf32> to vector<2x256xf32>
    %14 = vector.extract_strided_slice %7 {offsets = [0, 0], sizes = [2, 64], strides = [1, 1]} : vector<16x64xf32> to vector<2x64xf32>
    %cst_11 = arith.constant dense<0.000000e+00> : vector<2x256xf32>
    %15 = tpu.matmul %11, %6, %cst_11 {dimension_numbers = #tpu.dot_dimension_numbers<[1], [0], [0], [1], [0, 0, 1, 1], [], []>} : vector<2x64xf32>, vector<64x256xf32>, vector<2x256xf32> -> vector<2x256xf32>
    %16 = arith.addf %13, %15 : vector<2x256xf32>
    %17 = arith.negf %16 : vector<2x256xf32>
    %18 = math.exp %17 : vector<2x256xf32>
    %cst_12 = arith.constant 1.000000e+00 : f32
    %19 = vector.broadcast %cst_12 : f32 to vector<2x256xf32>
    %20 = arith.addf %19, %18 : vector<2x256xf32>
    %21 = arith.divf %19, %20 : vector<2x256xf32>
    %cst_13 = arith.constant 2.000000e+00 : f32
    %22 = vector.broadcast %cst_13 : f32 to vector<2x256xf32>
    %23 = arith.mulf %22, %21 : vector<2x256xf32>
    %cst_14 = arith.constant 1.000000e+00 : f32
    %24 = vector.broadcast %cst_14 : f32 to vector<2x256xf32>
    %25 = arith.subf %23, %24 : vector<2x256xf32>
    %26 = arith.select %10, %25, %21 : vector<2x256xi1>, vector<2x256xf32>
    %27 = vector.extract_strided_slice %26 {offsets = [0, 0], sizes = [2, 64], strides = [1, 1]} : vector<2x256xf32> to vector<2x64xf32>
    %28 = vector.extract_strided_slice %26 {offsets = [0, 64], sizes = [2, 64], strides = [1, 1]} : vector<2x256xf32> to vector<2x64xf32>
    %29 = vector.extract_strided_slice %26 {offsets = [0, 128], sizes = [2, 64], strides = [1, 1]} : vector<2x256xf32> to vector<2x64xf32>
    %30 = vector.extract_strided_slice %26 {offsets = [0, 192], sizes = [2, 64], strides = [1, 1]} : vector<2x256xf32> to vector<2x64xf32>
    %31 = arith.mulf %28, %12 : vector<2x64xf32>
    %32 = arith.mulf %27, %30 : vector<2x64xf32>
    %33 = arith.addf %31, %32 : vector<2x64xf32>
    %34 = math.tanh %33 : vector<2x64xf32>
    %35 = arith.mulf %29, %34 : vector<2x64xf32>
    %36 = arith.mulf %14, %35 : vector<2x64xf32>
    %37 = arith.subf %35, %11 : vector<2x64xf32>
    %38 = arith.mulf %14, %37 : vector<2x64xf32>
    %39 = arith.addf %11, %38 : vector<2x64xf32>
    %40 = arith.subf %33, %12 : vector<2x64xf32>
    %41 = arith.mulf %14, %40 : vector<2x64xf32>
    %42 = arith.addf %12, %41 : vector<2x64xf32>
    %43 = vector.extract_strided_slice %5 {offsets = [2, 0], sizes = [2, 256], strides = [1, 1]} : vector<16x256xf32> to vector<2x256xf32>
    %44 = vector.extract_strided_slice %7 {offsets = [2, 0], sizes = [2, 64], strides = [1, 1]} : vector<16x64xf32> to vector<2x64xf32>
    %cst_15 = arith.constant dense<0.000000e+00> : vector<2x256xf32>
    %45 = tpu.matmul %39, %6, %cst_15 {dimension_numbers = #tpu.dot_dimension_numbers<[1], [0], [0], [1], [0, 0, 1, 1], [], []>} : vector<2x64xf32>, vector<64x256xf32>, vector<2x256xf32> -> vector<2x256xf32>
    %46 = arith.addf %43, %45 : vector<2x256xf32>
    %47 = arith.negf %46 : vector<2x256xf32>
    %48 = math.exp %47 : vector<2x256xf32>
    %cst_16 = arith.constant 1.000000e+00 : f32
    %49 = vector.broadcast %cst_16 : f32 to vector<2x256xf32>
    %50 = arith.addf %49, %48 : vector<2x256xf32>
    %51 = arith.divf %49, %50 : vector<2x256xf32>
    %cst_17 = arith.constant 2.000000e+00 : f32
    %52 = vector.broadcast %cst_17 : f32 to vector<2x256xf32>
    %53 = arith.mulf %52, %51 : vector<2x256xf32>
    %cst_18 = arith.constant 1.000000e+00 : f32
    %54 = vector.broadcast %cst_18 : f32 to vector<2x256xf32>
    %55 = arith.subf %53, %54 : vector<2x256xf32>
    %56 = arith.select %10, %55, %51 : vector<2x256xi1>, vector<2x256xf32>
    %57 = vector.extract_strided_slice %56 {offsets = [0, 0], sizes = [2, 64], strides = [1, 1]} : vector<2x256xf32> to vector<2x64xf32>
    %58 = vector.extract_strided_slice %56 {offsets = [0, 64], sizes = [2, 64], strides = [1, 1]} : vector<2x256xf32> to vector<2x64xf32>
    %59 = vector.extract_strided_slice %56 {offsets = [0, 128], sizes = [2, 64], strides = [1, 1]} : vector<2x256xf32> to vector<2x64xf32>
    %60 = vector.extract_strided_slice %56 {offsets = [0, 192], sizes = [2, 64], strides = [1, 1]} : vector<2x256xf32> to vector<2x64xf32>
    %61 = arith.mulf %58, %42 : vector<2x64xf32>
    %62 = arith.mulf %57, %60 : vector<2x64xf32>
    %63 = arith.addf %61, %62 : vector<2x64xf32>
    %64 = math.tanh %63 : vector<2x64xf32>
    %65 = arith.mulf %59, %64 : vector<2x64xf32>
    %66 = arith.mulf %44, %65 : vector<2x64xf32>
    %67 = arith.subf %65, %39 : vector<2x64xf32>
    %68 = arith.mulf %44, %67 : vector<2x64xf32>
    %69 = arith.addf %39, %68 : vector<2x64xf32>
    %70 = arith.subf %63, %42 : vector<2x64xf32>
    %71 = arith.mulf %44, %70 : vector<2x64xf32>
    %72 = arith.addf %42, %71 : vector<2x64xf32>
    %73 = vector.extract_strided_slice %5 {offsets = [4, 0], sizes = [2, 256], strides = [1, 1]} : vector<16x256xf32> to vector<2x256xf32>
    %74 = vector.extract_strided_slice %7 {offsets = [4, 0], sizes = [2, 64], strides = [1, 1]} : vector<16x64xf32> to vector<2x64xf32>
    %cst_19 = arith.constant dense<0.000000e+00> : vector<2x256xf32>
    %75 = tpu.matmul %69, %6, %cst_19 {dimension_numbers = #tpu.dot_dimension_numbers<[1], [0], [0], [1], [0, 0, 1, 1], [], []>} : vector<2x64xf32>, vector<64x256xf32>, vector<2x256xf32> -> vector<2x256xf32>
    %76 = arith.addf %73, %75 : vector<2x256xf32>
    %77 = arith.negf %76 : vector<2x256xf32>
    %78 = math.exp %77 : vector<2x256xf32>
    %cst_20 = arith.constant 1.000000e+00 : f32
    %79 = vector.broadcast %cst_20 : f32 to vector<2x256xf32>
    %80 = arith.addf %79, %78 : vector<2x256xf32>
    %81 = arith.divf %79, %80 : vector<2x256xf32>
    %cst_21 = arith.constant 2.000000e+00 : f32
    %82 = vector.broadcast %cst_21 : f32 to vector<2x256xf32>
    %83 = arith.mulf %82, %81 : vector<2x256xf32>
    %cst_22 = arith.constant 1.000000e+00 : f32
    %84 = vector.broadcast %cst_22 : f32 to vector<2x256xf32>
    %85 = arith.subf %83, %84 : vector<2x256xf32>
    %86 = arith.select %10, %85, %81 : vector<2x256xi1>, vector<2x256xf32>
    %87 = vector.extract_strided_slice %86 {offsets = [0, 0], sizes = [2, 64], strides = [1, 1]} : vector<2x256xf32> to vector<2x64xf32>
    %88 = vector.extract_strided_slice %86 {offsets = [0, 64], sizes = [2, 64], strides = [1, 1]} : vector<2x256xf32> to vector<2x64xf32>
    %89 = vector.extract_strided_slice %86 {offsets = [0, 128], sizes = [2, 64], strides = [1, 1]} : vector<2x256xf32> to vector<2x64xf32>
    %90 = vector.extract_strided_slice %86 {offsets = [0, 192], sizes = [2, 64], strides = [1, 1]} : vector<2x256xf32> to vector<2x64xf32>
    %91 = arith.mulf %88, %72 : vector<2x64xf32>
    %92 = arith.mulf %87, %90 : vector<2x64xf32>
    %93 = arith.addf %91, %92 : vector<2x64xf32>
    %94 = math.tanh %93 : vector<2x64xf32>
    %95 = arith.mulf %89, %94 : vector<2x64xf32>
    %96 = arith.mulf %74, %95 : vector<2x64xf32>
    %97 = arith.subf %95, %69 : vector<2x64xf32>
    %98 = arith.mulf %74, %97 : vector<2x64xf32>
    %99 = arith.addf %69, %98 : vector<2x64xf32>
    %100 = arith.subf %93, %72 : vector<2x64xf32>
    %101 = arith.mulf %74, %100 : vector<2x64xf32>
    %102 = arith.addf %72, %101 : vector<2x64xf32>
    %103 = vector.extract_strided_slice %5 {offsets = [6, 0], sizes = [2, 256], strides = [1, 1]} : vector<16x256xf32> to vector<2x256xf32>
    %104 = vector.extract_strided_slice %7 {offsets = [6, 0], sizes = [2, 64], strides = [1, 1]} : vector<16x64xf32> to vector<2x64xf32>
    %cst_23 = arith.constant dense<0.000000e+00> : vector<2x256xf32>
    %105 = tpu.matmul %99, %6, %cst_23 {dimension_numbers = #tpu.dot_dimension_numbers<[1], [0], [0], [1], [0, 0, 1, 1], [], []>} : vector<2x64xf32>, vector<64x256xf32>, vector<2x256xf32> -> vector<2x256xf32>
    %106 = arith.addf %103, %105 : vector<2x256xf32>
    %107 = arith.negf %106 : vector<2x256xf32>
    %108 = math.exp %107 : vector<2x256xf32>
    %cst_24 = arith.constant 1.000000e+00 : f32
    %109 = vector.broadcast %cst_24 : f32 to vector<2x256xf32>
    %110 = arith.addf %109, %108 : vector<2x256xf32>
    %111 = arith.divf %109, %110 : vector<2x256xf32>
    %cst_25 = arith.constant 2.000000e+00 : f32
    %112 = vector.broadcast %cst_25 : f32 to vector<2x256xf32>
    %113 = arith.mulf %112, %111 : vector<2x256xf32>
    %cst_26 = arith.constant 1.000000e+00 : f32
    %114 = vector.broadcast %cst_26 : f32 to vector<2x256xf32>
    %115 = arith.subf %113, %114 : vector<2x256xf32>
    %116 = arith.select %10, %115, %111 : vector<2x256xi1>, vector<2x256xf32>
    %117 = vector.extract_strided_slice %116 {offsets = [0, 0], sizes = [2, 64], strides = [1, 1]} : vector<2x256xf32> to vector<2x64xf32>
    %118 = vector.extract_strided_slice %116 {offsets = [0, 64], sizes = [2, 64], strides = [1, 1]} : vector<2x256xf32> to vector<2x64xf32>
    %119 = vector.extract_strided_slice %116 {offsets = [0, 128], sizes = [2, 64], strides = [1, 1]} : vector<2x256xf32> to vector<2x64xf32>
    %120 = vector.extract_strided_slice %116 {offsets = [0, 192], sizes = [2, 64], strides = [1, 1]} : vector<2x256xf32> to vector<2x64xf32>
    %121 = arith.mulf %118, %102 : vector<2x64xf32>
    %122 = arith.mulf %117, %120 : vector<2x64xf32>
    %123 = arith.addf %121, %122 : vector<2x64xf32>
    %124 = math.tanh %123 : vector<2x64xf32>
    %125 = arith.mulf %119, %124 : vector<2x64xf32>
    %126 = arith.mulf %104, %125 : vector<2x64xf32>
    %127 = arith.subf %125, %99 : vector<2x64xf32>
    %128 = arith.mulf %104, %127 : vector<2x64xf32>
    %129 = arith.addf %99, %128 : vector<2x64xf32>
    %130 = arith.subf %123, %102 : vector<2x64xf32>
    %131 = arith.mulf %104, %130 : vector<2x64xf32>
    %132 = arith.addf %102, %131 : vector<2x64xf32>
    %133 = vector.extract_strided_slice %5 {offsets = [8, 0], sizes = [2, 256], strides = [1, 1]} : vector<16x256xf32> to vector<2x256xf32>
    %134 = vector.extract_strided_slice %7 {offsets = [8, 0], sizes = [2, 64], strides = [1, 1]} : vector<16x64xf32> to vector<2x64xf32>
    %cst_27 = arith.constant dense<0.000000e+00> : vector<2x256xf32>
    %135 = tpu.matmul %129, %6, %cst_27 {dimension_numbers = #tpu.dot_dimension_numbers<[1], [0], [0], [1], [0, 0, 1, 1], [], []>} : vector<2x64xf32>, vector<64x256xf32>, vector<2x256xf32> -> vector<2x256xf32>
    %136 = arith.addf %133, %135 : vector<2x256xf32>
    %137 = arith.negf %136 : vector<2x256xf32>
    %138 = math.exp %137 : vector<2x256xf32>
    %cst_28 = arith.constant 1.000000e+00 : f32
    %139 = vector.broadcast %cst_28 : f32 to vector<2x256xf32>
    %140 = arith.addf %139, %138 : vector<2x256xf32>
    %141 = arith.divf %139, %140 : vector<2x256xf32>
    %cst_29 = arith.constant 2.000000e+00 : f32
    %142 = vector.broadcast %cst_29 : f32 to vector<2x256xf32>
    %143 = arith.mulf %142, %141 : vector<2x256xf32>
    %cst_30 = arith.constant 1.000000e+00 : f32
    %144 = vector.broadcast %cst_30 : f32 to vector<2x256xf32>
    %145 = arith.subf %143, %144 : vector<2x256xf32>
    %146 = arith.select %10, %145, %141 : vector<2x256xi1>, vector<2x256xf32>
    %147 = vector.extract_strided_slice %146 {offsets = [0, 0], sizes = [2, 64], strides = [1, 1]} : vector<2x256xf32> to vector<2x64xf32>
    %148 = vector.extract_strided_slice %146 {offsets = [0, 64], sizes = [2, 64], strides = [1, 1]} : vector<2x256xf32> to vector<2x64xf32>
    %149 = vector.extract_strided_slice %146 {offsets = [0, 128], sizes = [2, 64], strides = [1, 1]} : vector<2x256xf32> to vector<2x64xf32>
    %150 = vector.extract_strided_slice %146 {offsets = [0, 192], sizes = [2, 64], strides = [1, 1]} : vector<2x256xf32> to vector<2x64xf32>
    %151 = arith.mulf %148, %132 : vector<2x64xf32>
    %152 = arith.mulf %147, %150 : vector<2x64xf32>
    %153 = arith.addf %151, %152 : vector<2x64xf32>
    %154 = math.tanh %153 : vector<2x64xf32>
    %155 = arith.mulf %149, %154 : vector<2x64xf32>
    %156 = arith.mulf %134, %155 : vector<2x64xf32>
    %157 = arith.subf %155, %129 : vector<2x64xf32>
    %158 = arith.mulf %134, %157 : vector<2x64xf32>
    %159 = arith.addf %129, %158 : vector<2x64xf32>
    %160 = arith.subf %153, %132 : vector<2x64xf32>
    %161 = arith.mulf %134, %160 : vector<2x64xf32>
    %162 = arith.addf %132, %161 : vector<2x64xf32>
    %163 = vector.extract_strided_slice %5 {offsets = [10, 0], sizes = [2, 256], strides = [1, 1]} : vector<16x256xf32> to vector<2x256xf32>
    %164 = vector.extract_strided_slice %7 {offsets = [10, 0], sizes = [2, 64], strides = [1, 1]} : vector<16x64xf32> to vector<2x64xf32>
    %cst_31 = arith.constant dense<0.000000e+00> : vector<2x256xf32>
    %165 = tpu.matmul %159, %6, %cst_31 {dimension_numbers = #tpu.dot_dimension_numbers<[1], [0], [0], [1], [0, 0, 1, 1], [], []>} : vector<2x64xf32>, vector<64x256xf32>, vector<2x256xf32> -> vector<2x256xf32>
    %166 = arith.addf %163, %165 : vector<2x256xf32>
    %167 = arith.negf %166 : vector<2x256xf32>
    %168 = math.exp %167 : vector<2x256xf32>
    %cst_32 = arith.constant 1.000000e+00 : f32
    %169 = vector.broadcast %cst_32 : f32 to vector<2x256xf32>
    %170 = arith.addf %169, %168 : vector<2x256xf32>
    %171 = arith.divf %169, %170 : vector<2x256xf32>
    %cst_33 = arith.constant 2.000000e+00 : f32
    %172 = vector.broadcast %cst_33 : f32 to vector<2x256xf32>
    %173 = arith.mulf %172, %171 : vector<2x256xf32>
    %cst_34 = arith.constant 1.000000e+00 : f32
    %174 = vector.broadcast %cst_34 : f32 to vector<2x256xf32>
    %175 = arith.subf %173, %174 : vector<2x256xf32>
    %176 = arith.select %10, %175, %171 : vector<2x256xi1>, vector<2x256xf32>
    %177 = vector.extract_strided_slice %176 {offsets = [0, 0], sizes = [2, 64], strides = [1, 1]} : vector<2x256xf32> to vector<2x64xf32>
    %178 = vector.extract_strided_slice %176 {offsets = [0, 64], sizes = [2, 64], strides = [1, 1]} : vector<2x256xf32> to vector<2x64xf32>
    %179 = vector.extract_strided_slice %176 {offsets = [0, 128], sizes = [2, 64], strides = [1, 1]} : vector<2x256xf32> to vector<2x64xf32>
    %180 = vector.extract_strided_slice %176 {offsets = [0, 192], sizes = [2, 64], strides = [1, 1]} : vector<2x256xf32> to vector<2x64xf32>
    %181 = arith.mulf %178, %162 : vector<2x64xf32>
    %182 = arith.mulf %177, %180 : vector<2x64xf32>
    %183 = arith.addf %181, %182 : vector<2x64xf32>
    %184 = math.tanh %183 : vector<2x64xf32>
    %185 = arith.mulf %179, %184 : vector<2x64xf32>
    %186 = arith.mulf %164, %185 : vector<2x64xf32>
    %187 = arith.subf %185, %159 : vector<2x64xf32>
    %188 = arith.mulf %164, %187 : vector<2x64xf32>
    %189 = arith.addf %159, %188 : vector<2x64xf32>
    %190 = arith.subf %183, %162 : vector<2x64xf32>
    %191 = arith.mulf %164, %190 : vector<2x64xf32>
    %192 = arith.addf %162, %191 : vector<2x64xf32>
    %193 = vector.extract_strided_slice %5 {offsets = [12, 0], sizes = [2, 256], strides = [1, 1]} : vector<16x256xf32> to vector<2x256xf32>
    %194 = vector.extract_strided_slice %7 {offsets = [12, 0], sizes = [2, 64], strides = [1, 1]} : vector<16x64xf32> to vector<2x64xf32>
    %cst_35 = arith.constant dense<0.000000e+00> : vector<2x256xf32>
    %195 = tpu.matmul %189, %6, %cst_35 {dimension_numbers = #tpu.dot_dimension_numbers<[1], [0], [0], [1], [0, 0, 1, 1], [], []>} : vector<2x64xf32>, vector<64x256xf32>, vector<2x256xf32> -> vector<2x256xf32>
    %196 = arith.addf %193, %195 : vector<2x256xf32>
    %197 = arith.negf %196 : vector<2x256xf32>
    %198 = math.exp %197 : vector<2x256xf32>
    %cst_36 = arith.constant 1.000000e+00 : f32
    %199 = vector.broadcast %cst_36 : f32 to vector<2x256xf32>
    %200 = arith.addf %199, %198 : vector<2x256xf32>
    %201 = arith.divf %199, %200 : vector<2x256xf32>
    %cst_37 = arith.constant 2.000000e+00 : f32
    %202 = vector.broadcast %cst_37 : f32 to vector<2x256xf32>
    %203 = arith.mulf %202, %201 : vector<2x256xf32>
    %cst_38 = arith.constant 1.000000e+00 : f32
    %204 = vector.broadcast %cst_38 : f32 to vector<2x256xf32>
    %205 = arith.subf %203, %204 : vector<2x256xf32>
    %206 = arith.select %10, %205, %201 : vector<2x256xi1>, vector<2x256xf32>
    %207 = vector.extract_strided_slice %206 {offsets = [0, 0], sizes = [2, 64], strides = [1, 1]} : vector<2x256xf32> to vector<2x64xf32>
    %208 = vector.extract_strided_slice %206 {offsets = [0, 64], sizes = [2, 64], strides = [1, 1]} : vector<2x256xf32> to vector<2x64xf32>
    %209 = vector.extract_strided_slice %206 {offsets = [0, 128], sizes = [2, 64], strides = [1, 1]} : vector<2x256xf32> to vector<2x64xf32>
    %210 = vector.extract_strided_slice %206 {offsets = [0, 192], sizes = [2, 64], strides = [1, 1]} : vector<2x256xf32> to vector<2x64xf32>
    %211 = arith.mulf %208, %192 : vector<2x64xf32>
    %212 = arith.mulf %207, %210 : vector<2x64xf32>
    %213 = arith.addf %211, %212 : vector<2x64xf32>
    %214 = math.tanh %213 : vector<2x64xf32>
    %215 = arith.mulf %209, %214 : vector<2x64xf32>
    %216 = arith.mulf %194, %215 : vector<2x64xf32>
    %217 = arith.subf %215, %189 : vector<2x64xf32>
    %218 = arith.mulf %194, %217 : vector<2x64xf32>
    %219 = arith.addf %189, %218 : vector<2x64xf32>
    %220 = arith.subf %213, %192 : vector<2x64xf32>
    %221 = arith.mulf %194, %220 : vector<2x64xf32>
    %222 = arith.addf %192, %221 : vector<2x64xf32>
    %223 = vector.extract_strided_slice %5 {offsets = [14, 0], sizes = [2, 256], strides = [1, 1]} : vector<16x256xf32> to vector<2x256xf32>
    %224 = vector.extract_strided_slice %7 {offsets = [14, 0], sizes = [2, 64], strides = [1, 1]} : vector<16x64xf32> to vector<2x64xf32>
    %cst_39 = arith.constant dense<0.000000e+00> : vector<2x256xf32>
    %225 = tpu.matmul %219, %6, %cst_39 {dimension_numbers = #tpu.dot_dimension_numbers<[1], [0], [0], [1], [0, 0, 1, 1], [], []>} : vector<2x64xf32>, vector<64x256xf32>, vector<2x256xf32> -> vector<2x256xf32>
    %226 = arith.addf %223, %225 : vector<2x256xf32>
    %227 = arith.negf %226 : vector<2x256xf32>
    %228 = math.exp %227 : vector<2x256xf32>
    %cst_40 = arith.constant 1.000000e+00 : f32
    %229 = vector.broadcast %cst_40 : f32 to vector<2x256xf32>
    %230 = arith.addf %229, %228 : vector<2x256xf32>
    %231 = arith.divf %229, %230 : vector<2x256xf32>
    %cst_41 = arith.constant 2.000000e+00 : f32
    %232 = vector.broadcast %cst_41 : f32 to vector<2x256xf32>
    %233 = arith.mulf %232, %231 : vector<2x256xf32>
    %cst_42 = arith.constant 1.000000e+00 : f32
    %234 = vector.broadcast %cst_42 : f32 to vector<2x256xf32>
    %235 = arith.subf %233, %234 : vector<2x256xf32>
    %236 = arith.select %10, %235, %231 : vector<2x256xi1>, vector<2x256xf32>
    %237 = vector.extract_strided_slice %236 {offsets = [0, 0], sizes = [2, 64], strides = [1, 1]} : vector<2x256xf32> to vector<2x64xf32>
    %238 = vector.extract_strided_slice %236 {offsets = [0, 64], sizes = [2, 64], strides = [1, 1]} : vector<2x256xf32> to vector<2x64xf32>
    %239 = vector.extract_strided_slice %236 {offsets = [0, 128], sizes = [2, 64], strides = [1, 1]} : vector<2x256xf32> to vector<2x64xf32>
    %240 = vector.extract_strided_slice %236 {offsets = [0, 192], sizes = [2, 64], strides = [1, 1]} : vector<2x256xf32> to vector<2x64xf32>
    %241 = arith.mulf %238, %222 : vector<2x64xf32>
    %242 = arith.mulf %237, %240 : vector<2x64xf32>
    %243 = arith.addf %241, %242 : vector<2x64xf32>
    %244 = math.tanh %243 : vector<2x64xf32>
    %245 = arith.mulf %239, %244 : vector<2x64xf32>
    %246 = arith.mulf %224, %245 : vector<2x64xf32>
    %247 = arith.subf %245, %219 : vector<2x64xf32>
    %248 = arith.mulf %224, %247 : vector<2x64xf32>
    %249 = arith.addf %219, %248 : vector<2x64xf32>
    %250 = vector.extract_strided_slice %36 {offsets = [0, 0], sizes = [2, 32], strides = [1, 1]} : vector<2x64xf32> to vector<2x32xf32>
    %251 = vector.extract_strided_slice %246 {offsets = [0, 32], sizes = [2, 32], strides = [1, 1]} : vector<2x64xf32> to vector<2x32xf32>
    %252 = tpu.concatenate %250, %251 in 1 : vector<2x32xf32>, vector<2x32xf32> -> vector<2x64xf32>
    %253 = vector.extract_strided_slice %66 {offsets = [0, 0], sizes = [2, 32], strides = [1, 1]} : vector<2x64xf32> to vector<2x32xf32>
    %254 = vector.extract_strided_slice %216 {offsets = [0, 32], sizes = [2, 32], strides = [1, 1]} : vector<2x64xf32> to vector<2x32xf32>
    %255 = tpu.concatenate %253, %254 in 1 : vector<2x32xf32>, vector<2x32xf32> -> vector<2x64xf32>
    %256 = vector.extract_strided_slice %96 {offsets = [0, 0], sizes = [2, 32], strides = [1, 1]} : vector<2x64xf32> to vector<2x32xf32>
    %257 = vector.extract_strided_slice %186 {offsets = [0, 32], sizes = [2, 32], strides = [1, 1]} : vector<2x64xf32> to vector<2x32xf32>
    %258 = tpu.concatenate %256, %257 in 1 : vector<2x32xf32>, vector<2x32xf32> -> vector<2x64xf32>
    %259 = vector.extract_strided_slice %126 {offsets = [0, 0], sizes = [2, 32], strides = [1, 1]} : vector<2x64xf32> to vector<2x32xf32>
    %260 = vector.extract_strided_slice %156 {offsets = [0, 32], sizes = [2, 32], strides = [1, 1]} : vector<2x64xf32> to vector<2x32xf32>
    %261 = tpu.concatenate %259, %260 in 1 : vector<2x32xf32>, vector<2x32xf32> -> vector<2x64xf32>
    %262 = vector.extract_strided_slice %156 {offsets = [0, 0], sizes = [2, 32], strides = [1, 1]} : vector<2x64xf32> to vector<2x32xf32>
    %263 = vector.extract_strided_slice %126 {offsets = [0, 32], sizes = [2, 32], strides = [1, 1]} : vector<2x64xf32> to vector<2x32xf32>
    %264 = tpu.concatenate %262, %263 in 1 : vector<2x32xf32>, vector<2x32xf32> -> vector<2x64xf32>
    %265 = vector.extract_strided_slice %186 {offsets = [0, 0], sizes = [2, 32], strides = [1, 1]} : vector<2x64xf32> to vector<2x32xf32>
    %266 = vector.extract_strided_slice %96 {offsets = [0, 32], sizes = [2, 32], strides = [1, 1]} : vector<2x64xf32> to vector<2x32xf32>
    %267 = tpu.concatenate %265, %266 in 1 : vector<2x32xf32>, vector<2x32xf32> -> vector<2x64xf32>
    %268 = vector.extract_strided_slice %216 {offsets = [0, 0], sizes = [2, 32], strides = [1, 1]} : vector<2x64xf32> to vector<2x32xf32>
    %269 = vector.extract_strided_slice %66 {offsets = [0, 32], sizes = [2, 32], strides = [1, 1]} : vector<2x64xf32> to vector<2x32xf32>
    %270 = tpu.concatenate %268, %269 in 1 : vector<2x32xf32>, vector<2x32xf32> -> vector<2x64xf32>
    %271 = vector.extract_strided_slice %246 {offsets = [0, 0], sizes = [2, 32], strides = [1, 1]} : vector<2x64xf32> to vector<2x32xf32>
    %272 = vector.extract_strided_slice %36 {offsets = [0, 32], sizes = [2, 32], strides = [1, 1]} : vector<2x64xf32> to vector<2x32xf32>
    %273 = tpu.concatenate %271, %272 in 1 : vector<2x32xf32>, vector<2x32xf32> -> vector<2x64xf32>
    %274 = tpu.concatenate %252, %255, %258, %261, %264, %267, %270, %273 in 0 : vector<2x64xf32>, vector<2x64xf32>, vector<2x64xf32>, vector<2x64xf32>, vector<2x64xf32>, vector<2x64xf32>, vector<2x64xf32>, vector<2x64xf32> -> vector<16x64xf32>
    %c0_43 = arith.constant 0 : index
    %c0_44 = arith.constant 0 : index
    %275 = vector.load %arg5[%c0_43, %c0_44] : memref<64x128xf32, #tpu.memory_space<vmem>>, vector<64x128xf32>
    %cst_45 = arith.constant dense<0.000000e+00> : vector<16x128xf32>
    %276 = tpu.matmul %274, %275, %cst_45 {dimension_numbers = #tpu.dot_dimension_numbers<[1], [0], [0], [1], [0, 0, 1, 1], [], []>} : vector<16x64xf32>, vector<64x128xf32>, vector<16x128xf32> -> vector<16x128xf32>
    %c0_46 = arith.constant 0 : index
    %c0_47 = arith.constant 0 : index
    %277 = vector.load %arg6[%c0_46, %c0_47] : memref<1x128xf32, #tpu.memory_space<vmem>>, vector<1x128xf32>
    %278 = vector.broadcast %277 : vector<1x128xf32> to vector<16x128xf32>
    %279 = arith.addf %276, %278 : vector<16x128xf32>
    %c0_48 = arith.constant 0 : index
    %c0_49 = arith.constant 0 : index
    %280 = vector.load %arg9[%c0_48, %c0_49] : memref<16x128xf32, #tpu.memory_space<vmem>>, vector<16x128xf32>
    tpu.vector_store %arg9[%c0_48, %c0_49], %279 {strides = array<i32>} : memref<16x128xf32, #tpu.memory_space<vmem>>, vector<16x128xf32>,
    %c0_50 = arith.constant 0 : index
    %c0_51 = arith.constant 0 : index
    %281 = vector.load %arg7[%c0_50, %c0_51] : memref<64x8xf32, #tpu.memory_space<vmem>>, vector<64x8xf32>
    %cst_52 = arith.constant dense<0.000000e+00> : vector<2x8xf32>
    %282 = tpu.matmul %249, %281, %cst_52 {dimension_numbers = #tpu.dot_dimension_numbers<[1], [0], [0], [1], [0, 0, 1, 1], [], []>} : vector<2x64xf32>, vector<64x8xf32>, vector<2x8xf32> -> vector<2x8xf32>
    %c0_53 = arith.constant 0 : index
    %c0_54 = arith.constant 0 : index
    %283 = vector.load %arg8[%c0_53, %c0_54] : memref<1x8xf32, #tpu.memory_space<vmem>>, vector<1x8xf32>
    %284 = vector.broadcast %283 : vector<1x8xf32> to vector<2x8xf32>
    %285 = arith.addf %282, %284 : vector<2x8xf32>
    %c0_55 = arith.constant 0 : index
    %c0_56 = arith.constant 0 : index
    %286 = vector.load %arg10[%c0_55, %c0_56] : memref<2x8xf32, #tpu.memory_space<vmem>>, vector<2x8xf32>
    tpu.vector_store %arg10[%c0_55, %c0_56], %285 {strides = array<i32>} : memref<2x8xf32, #tpu.memory_space<vmem>>, vector<2x8xf32>,
    return
  }
}

</mosaic_0001>

<bundles_post_ra>
// kernel: do_model_ias_forward.1
= control target key start
LH: loop header
LB: loop body
LE: loop exit
PB: predicated region body
PF: predicated region fallthrough
CT: control target
= control target key end

     0   :  { %v1885_v7 = vmov 0.0   ;;  %s2409_s0 = inlined_call_operand.vmem [shape: f32[16,64], index: 0, kind: input, shape index: {}]   ;;  %s2410_s1 = inlined_call_operand.vmem [shape: f32[16,64], index: 1, kind: input, shape index: {}]   ;;  %s2411_s2 = inlined_call_operand.vmem [shape: f32[64,256], index: 2, kind: input, shape index: {}]   ;;  %s2412_s3 = inlined_call_operand.vmem [shape: f32[64,256], index: 3, kind: input, shape index: {}]   ;;  %s2413_s4 = inlined_call_operand.vmem [shape: f32[1,256], index: 4, kind: input, shape index: {}]   ;;  %s2414_s5 = inlined_call_operand.vmem [shape: f32[64,128], index: 5, kind: input, shape index: {}]   ;;  %s2415_s6 = inlined_call_operand.vmem [shape: f32[1,128], index: 6, kind: input, shape index: {}]   ;;  %s2416_s7 = inlined_call_operand.vmem [shape: f32[64,8], index: 7, kind: input, shape index: {}]   ;;  %s2417_s8 = inlined_call_operand.vmem [shape: f32[1,8], index: 8, kind: input, shape index: {}]   ;;  %s2418_s9 = inlined_call_operand.vmem [shape: f32[16,128], index: 9, kind: output, shape index: {0}]   ;;  %s2419_s10 = inlined_call_operand.hbm [shape: f32[2,8], index: 10, kind: output, shape index: {1}]  }
   0x1   :  { %v38_v0 = vld [vmem:[%s2411_s2 + $0x8] sm:$0xff]  ;;  %v40_v1 = vld [vmem:[%s2411_s2 + $0x18] sm:$0xff]  ;;  %v37_v2 = vld [vmem:[%s2411_s2] sm:$0xff]  ;;  %136 = vmatprep.mubr.f32.mxu0 %v1885_v7  ;;  %239 = vmatprep.mubr.f32.mxu1 %v1885_v7 }
   0x2   :  { %v1604_v3 = vpack.c.bf16 %v40_v1, %v38_v0  ;;  %v39_v4 = vld [vmem:[%s2411_s2 + $0x10] sm:$0xff]  ;;  %v150_v5 = vld [vmem:[%s2412_s3 + $0x8] sm:$0xff]  ;;  %v152_v6 = vld [vmem:[%s2412_s3 + $0x18] sm:$0xff] }
   0x3   :  { %v1606_v8 = vpack.c.bf16 %v39_v4, %v37_v2  ;;  %v1965_v9 = vpack.c.bf16 %v152_v6, %v150_v5  ;;  %v149_v10 = vld [vmem:[%s2412_s3] sm:$0xff]  ;;  %v151_v11 = vld [vmem:[%s2412_s3 + $0x10] sm:$0xff]  ;;  %v42_v12 = vld [vmem:[%s2411_s2 + $0x28] sm:$0xff] }
   0x4   :  { %1605 = vmatprep.subr.bf16.mxu0 %v1604_v3  ;;  %v1976_v13 = vpack.c.bf16 %v151_v11, %v149_v10  ;;  %v44_v14 = vld [vmem:[%s2411_s2 + $0x38] sm:$0xff]  ;;  %v41_v15 = vld [vmem:[%s2411_s2 + $0x20] sm:$0xff]  ;;  %v43_v16 = vld [vmem:[%s2411_s2 + $0x30] sm:$0xff] }
   0x5   :  { %1607 = vmatpush1.bf16.msra.mxu0 %v1606_v8  ;;  %1621 = vmatprep.subr.bf16.mxu1 %v1965_v9  ;;  %v1608_v17 = vpack.c.bf16 %v44_v14, %v42_v12  ;;  %v1610_v18 = vpack.c.bf16 %v43_v16, %v41_v15  ;;  %v154_v19 = vld [vmem:[%s2412_s3 + $0x28] sm:$0xff]  ;;  %v156_v20 = vld [vmem:[%s2412_s3 + $0x38] sm:$0xff]  ;;  %v153_v21 = vld [vmem:[%s2412_s3 + $0x20] sm:$0xff] }
   0x6   :  { %1623 = vmatpush1.bf16.msra.mxu1 %v1976_v13  ;;  %v1998_v22 = vpack.c.bf16 %v156_v20, %v154_v19  ;;  %v155_v23 = vld [vmem:[%s2412_s3 + $0x30] sm:$0xff]  ;;  %v46_v24 = vld [vmem:[%s2411_s2 + $0x48] sm:$0xff]  ;;  %v48_v25 = vld [vmem:[%s2411_s2 + $0x58] sm:$0xff] }
   0x7   :  { %1609 = vmatprep.subr.bf16.mxu0 %v1608_v17  ;;  %v2009_v26 = vpack.c.bf16 %v155_v23, %v153_v21  ;;  %v1612_v27 = vpack.c.bf16 %v48_v25, %v46_v24  ;;  %v45_v28 = vld [vmem:[%s2411_s2 + $0x40] sm:$0xff]  ;;  %v47_v29 = vld [vmem:[%s2411_s2 + $0x50] sm:$0xff]  ;;  %v158_v30 = vld [vmem:[%s2412_s3 + $0x48] sm:$0xff] }
   0x8   :  { %1625 = vmatprep.subr.bf16.mxu1 %v1998_v22  ;;  %v160_v31 = vld [vmem:[%s2412_s3 + $0x58] sm:$0xff]  ;;  %v157_v32 = vld [vmem:[%s2412_s3 + $0x40] sm:$0xff]  ;;  %v159_v33 = vld [vmem:[%s2412_s3 + $0x50] sm:$0xff]  ;;  %v1614_v34 = vpack.c.bf16 %v47_v29, %v45_v28 }
   0x9   :  { %1611 = vmatpush1.bf16.msra.mxu0 %v1610_v18  ;;  %v2030_v35 = vpack.c.bf16 %v160_v31, %v158_v30  ;;  %v50_v36 = vld [vmem:[%s2411_s2 + $0x68] sm:$0xff]  ;;  %v52_v37 = vld [vmem:[%s2411_s2 + $0x78] sm:$0xff]  ;;  %v49_v38 = vld [vmem:[%s2411_s2 + $0x60] sm:$0xff]  ;;  %v2042_v39 = vpack.c.bf16 %v159_v33, %v157_v32 }
   0xa   :  { %1627 = vmatpush1.bf16.msra.mxu1 %v2009_v26  ;;  %1613 = vmatprep.subr.bf16.mxu0 %v1612_v27  ;;  %v1616_v40 = vpack.c.bf16 %v52_v37, %v50_v36  ;;  %v51_v41 = vld [vmem:[%s2411_s2 + $0x70] sm:$0xff]  ;;  %v162_v42 = vld [vmem:[%s2412_s3 + $0x68] sm:$0xff]  ;;  %v164_v43 = vld [vmem:[%s2412_s3 + $0x78] sm:$0xff] }
   0xb   :  { %1629 = vmatprep.subr.bf16.mxu1 %v2030_v35  ;;  %v2054_v44 = vpack.c.bf16 %v164_v43, %v162_v42  ;;  %v161_v45 = vld [vmem:[%s2412_s3 + $0x60] sm:$0xff]  ;;  %v163_v46 = vld [vmem:[%s2412_s3 + $0x70] sm:$0xff] }
   0xc   :  { %16 = vsyncpa [#allocation3], 0  ;;  %v1618_v47 = vpack.c.bf16 %v51_v41, %v49_v38  ;;  %v2063_v48 = vpack.c.bf16 %v163_v46, %v161_v45  ;;  %v35_v49 = vld [vmem:[%s2410_s1] sm:$0xff]  ;;  %vm65_vm0 = vcmask 523264   ;;  %v55_v50 = vlaneseq  ;;  %v36_v19 = vld [vmem:[%s2410_s1 + $0x8] sm:$0xff] }
   0xd   :  { %1615 = vmatpush1.bf16.msra.mxu0 %v1614_v34  ;;  %v53_v53 = vld [vmem:[%s2413_s4] sm:$0x3]  ;;  %s1886_s4 = smov 64   ;;  %vm1256_vm2 = vcmask 261120   ;;  %vm1286_vm3 = vcmask 1041408   ;;  %vm1288_vm4 = vcmask 1043456  }
   0xe   :  { %1631 = vmatpush1.bf16.msra.mxu1 %v2042_v39  ;;  %1617 = vmatprep.subr.bf16.mxu0 %v1616_v40  ;;  %v56_v51 = vshrl.u32 %v55_v50, 7  ;;  %v168_v0 = vand.u32 127, %v55_v50  ;;  %v2128_v28 = vld [vmem:[%s2409_s0] sm:$0xff]  ;;  %vm1888_vm5 = vmmov 0   ;;  %vm1290_vm6 = vcmask 1045504  }
   0xf   :  { %1633 = vmatprep.subr.bf16.mxu1 %v2054_v44  ;;  %vm1481_vm7 = vcmask 58368  }
  0x10   :  { %v61_v52 = vsub.s32 1, %v56_v51  ;;  %v2101_v1 = vadd.s32 128, %v168_v0  ;;  %v57_v6 = vsub.s32 0, %v56_v51 }
  0x11   :  { %1619 = vmatpush1.bf16.msra.mxu0 %v1618_v47 }
  0x12   :  { %1635 = vmatpush1.bf16.msra.mxu1 %v2063_v48  ;;  %1637 = vmatprep.subr.bf16.mxu0 %v1965_v9  ;;  %v2095_v54 = vrot.slane %v53_v53, %v61_v52  ;;  %vm171_vm1 = vcmp.ge.s32.totalorder %v2101_v1, 192  ;;  %v2107_v8 = vrot.slane %v53_v53, %v57_v6  ;;  %v1295_v1 = vld [vmem:[%s2414_s5] sm:$0xff] }
  0x13   :  { %1653 = vmatprep.subr.bf16.mxu1 %v1965_v9 }
  0x14   :  { %1501 = vmatmul.mubr.msk.f32.vlgmr.msra.gmra.mrb[0].mxu0 %vm65_vm0, %v35_v49 }
  0x15   :  { %240 = vmatmul.mubr.f32.vlgmr.msra.gmra.mrb[0].mxu1 %v1885_v7  ;;  %1639 = vmatpush1.bf16.msra.mxu0 %v1976_v13 }
  0x16   :  { %1641 = vmatprep.subr.bf16.mxu0 %v1998_v22  ;;  %142 = vmatprep.mubr.f32.mxu0 %v1885_v7 }
  0x17   :  { %1655 = vmatpush1.bf16.msra.mxu1 %v1976_v13  ;;  %499 = vmatprep.mubr.f32.mxu1 %v1885_v7 }
  0x18   :  { %1657 = vmatprep.subr.bf16.mxu1 %v1998_v22  ;;  %1502 = vmatmul.mubr.msk.f32.gmra.mrb[2].mxu0 %vm65_vm0, %v36_v19 }
  0x19   :  { %1643 = vmatpush1.bf16.msra.mxu0 %v2009_v26  ;;  %358 = vmatprep.mubr.f32.mxu0 %v1885_v7 }
  0x1a   :  { %1645 = vmatprep.subr.bf16.mxu0 %v2030_v35 }
  0x1b   :  { %1659 = vmatpush1.bf16.msra.mxu1 %v2009_v26 }
  0x1c   :  { %1661 = vmatprep.subr.bf16.mxu1 %v2030_v35 }
  0x1d   :  { %1647 = vmatpush1.bf16.msra.mxu0 %v2042_v39 }
  0x1e   :  { %1649 = vmatprep.subr.bf16.mxu0 %v2054_v44 }
  0x1f   :  { %1663 = vmatpush1.bf16.msra.mxu1 %v2042_v39 }
  0x20   :  { %1665 = vmatprep.subr.bf16.mxu1 %v2054_v44 }
  0x21   :  { %1651 = vmatpush1.bf16.msra.mxu0 %v2063_v48 }
  0x22   :  { %1669 = vmatprep.subr.bf16.mxu0 %v1965_v9 }
  0x23   :  { %1667 = vmatpush1.bf16.msra.mxu1 %v2063_v48 }
  0x24   :  { %1685 = vmatprep.subr.bf16.mxu1 %v1965_v9 }
  0xe7   :  { %v138_v55 = vpop.f32.mrb[0].mxu0 }
  0xe8   :  { %v140_v56 = vpop.f32.mrb[1].mxu0  ;;  %v241_v57 = vpop.f32.mrb[0].mxu1  ;;  %v2110_v10 = vadd.f32 %v138_v55, %v2107_v8 }
  0xe9   :  { %v2098_v58 = vadd.f32 %v140_v56, %v2095_v54  ;;  %v243_v59 = vpop.f32.mrb[1].mxu1 }
  0xea   :  { %v246_v11 = vadd.f32 %v241_v57, %v2110_v10 }
  0xeb   :  { %v247_v60 = vadd.f32 %v243_v59, %v2098_v58  ;;  %v2121_v25 = vpop.f32.mrb[2].mxu0 }
  0xec   :  { %v1503_v12 = vmul.f32 -1.442695, %v246_v11  ;;  %v2123_v27 = vpop.f32.mrb[3].mxu0 }
  0xed   :  { %v1504_v61 = vmul.f32 -1.442695, %v247_v60 }
  0xef   :  { %1781 = vpow2.f32 %v1504_v61 }
  0xf9   :  { %v1782_v62 = vpop.eup %1781 }
  0xfa   :  { %v255_v63 = vadd.f32 1.0, %v1782_v62 }
  0xfc   :  { %1783 = vrcp.f32 %v255_v63 }
  0xfd   :  { %1785 = vpow2.f32 %v1503_v12 }
 0x106   :  { %v1784_v2 = vpop.eup %1783 }
 0x107   :  { %v261_v3 = vmul.f32 2.0, %v1784_v2  ;;  %v1786_v14 = vpop.eup %1785 }
 0x108   :  { %v254_v15 = vadd.f32 1.0, %v1786_v14 }
 0x109   :  { %v1506_v4 = vadd.f32 -1.0, %v261_v3 }
 0x10a   :  { %1787 = vrcp.f32 %v254_v15 }
 0x10b   :  { %v265_v5 = vsel %vm171_vm1, %v1506_v4, %v1784_v2 }
 0x10c   :  { %268 = vrot.lane.b32.xlu0 %v265_v5, %s1886_s4 }
 0x114   :  { %v1788_v16 = vpop.eup %1787 }
 0x115   :  { %v266_v20 = vmul.f32 0.0, %v1788_v16 }
 0x17e   :  { %v269_v17 = vpop.permute.xlu0 %268 }
 0x17f   :  { %v271_v18 = vmul.f32 %v1788_v16, %v269_v17 }
 0x181   :  { %273 = vrot.lane.b32.xlu0 %v271_v18, %s1886_s4 }
 0x1f3   :  { %v274_v21 = vpop.permute.xlu0 %273 }
 0x1f4   :  { %v276_v23 = vadd.f32 %v274_v21, %v266_v20 }
 0x1f6   :  { %1789 = vtanh.f32 %v276_v23 }
 0x200   :  { %v1790_v24 = vpop.eup %1789 }
 0x201   :  { %279 = vrot.lane.b32.xlu1 %v1790_v24, %s1886_s4 }
 0x205   :  { %286 = vrot.lane.b32.xlu1 %v276_v23, %s1886_s4 }
 0x273   :  { %v280_v29 = vpop.permute.xlu1 %279 }
 0x274   :  { %v282_v30 = vmul.f32 %v280_v29, %v265_v5 }
 0x276   :  { %v2131_v31 = vmul.f32 %v282_v30, %v2128_v28 }
 0x277   :  { %v287_v32 = vpop.permute.xlu1 %286 }
 0x278   :  { %v289_v33 = vmul.f32 %v287_v32, %v2128_v28  ;;  %1507 = vmatmul.mubr.msk.f32.vlgmr.msra.gmra.mrb[4].mxu0 %vm65_vm0, %v2131_v31  ;;  %v414_v14 = vrot.slane %v2131_v31, 6 }
 0x279   :  { %1671 = vmatpush1.bf16.msra.mxu0 %v1976_v13  ;;  %640 = vmatprep.mubr.f32.mxu0 %v1885_v7 }
 0x27a   :  { %v392_v34 = vrot.slane %v289_v33, 6  ;;  %1673 = vmatprep.subr.bf16.mxu0 %v1998_v22 }
 0x27c   :  { %393 = vrot.lane.b32.xlu1 %v392_v34, %s1886_s4 }
 0x27d   :  { %1675 = vmatpush1.bf16.msra.mxu0 %v2009_v26 }
 0x27e   :  { %1677 = vmatprep.subr.bf16.mxu0 %v2030_v35 }
 0x281   :  { %1679 = vmatpush1.bf16.msra.mxu0 %v2042_v39 }
 0x282   :  { %1681 = vmatprep.subr.bf16.mxu0 %v2054_v44 }
 0x285   :  { %1683 = vmatpush1.bf16.msra.mxu0 %v2063_v48 }
 0x286   :  { %1701 = vmatprep.subr.bf16.mxu0 %v1965_v9 }
 0x2ee   :  { %v394_v60 = vpop.permute.xlu1 %393 }
 0x34b   :  { %v360_v36 = vpop.f32.mrb[4].mxu0 }
 0x34c   :  { %v362_v37 = vpop.f32.mrb[5].mxu0  ;;  %v367_v50 = vrot.slane %v360_v36, 6 }
 0x34d   :  { %v368_v38 = vrot.slane %v362_v37, 6 }
 0x34e   :  { %v371_v51 = vadd.f32 %v367_v50, %v2110_v10 }
 0x34f   :  { %v372_v40 = vadd.f32 %v368_v38, %v2098_v58 }
 0x350   :  { %v1508_v52 = vmul.f32 -1.442695, %v371_v51 }
 0x351   :  { %v1509_v41 = vmul.f32 -1.442695, %v372_v40 }
 0x353   :  { %1791 = vpow2.f32 %v1509_v41 }
 0x35d   :  { %v1792_v42 = vpop.eup %1791 }
 0x35e   :  { %v380_v43 = vadd.f32 1.0, %v1792_v42 }
 0x360   :  { %1793 = vrcp.f32 %v380_v43 }
 0x361   :  { %1795 = vpow2.f32 %v1508_v52 }
 0x36a   :  { %v1794_v45 = vpop.eup %1793 }
 0x36b   :  { %v386_v46 = vmul.f32 2.0, %v1794_v45  ;;  %v1796_v53 = vpop.eup %1795 }
 0x36c   :  { %v379_v55 = vadd.f32 1.0, %v1796_v53 }
 0x36d   :  { %v1511_v47 = vadd.f32 -1.0, %v386_v46 }
 0x36e   :  { %1797 = vrcp.f32 %v379_v55 }
 0x36f   :  { %v390_v49 = vsel %vm171_vm1, %v1511_v47, %v1794_v45 }
 0x370   :  { %398 = vrot.lane.b32.xlu0 %v390_v49, %s1886_s4 }
 0x378   :  { %v1798_v56 = vpop.eup %1797 }
 0x379   :  { %v396_v61 = vmul.f32 %v1798_v56, %v394_v60 }
 0x3e2   :  { %v399_v57 = vpop.permute.xlu0 %398 }
 0x3e3   :  { %v401_v59 = vmul.f32 %v1798_v56, %v399_v57 }
 0x3e5   :  { %403 = vrot.lane.b32.xlu0 %v401_v59, %s1886_s4 }
 0x457   :  { %v404_v62 = vpop.permute.xlu0 %403 }
 0x458   :  { %v406_v63 = vadd.f32 %v404_v62, %v396_v61 }
 0x45a   :  { %1799 = vtanh.f32 %v406_v63  ;;  %v422_v0 = vsub.f32 %v406_v63, %v394_v60 }
 0x45c   :  { %424 = vrot.lane.b32.xlu0 %v422_v0, %s1886_s4 }
 0x464   :  { %v1800_v2 = vpop.eup %1799 }
 0x465   :  { %409 = vrot.lane.b32.xlu1 %v1800_v2, %s1886_s4 }
 0x4ce   :  { %v425_v3 = vpop.permute.xlu0 %424 }
 0x4cf   :  { %v427_v4 = vmul.f32 %v425_v3, %v2128_v28 }
 0x4d1   :  { %v429_v5 = vrot.slane %v427_v4, 2 }
 0x4d3   :  { %v431_v6 = vadd.f32 %v429_v5, %v289_v33 }
 0x4d5   :  { %v533_v11 = vrot.slane %v431_v6, 4 }
 0x4d7   :  { %534 = vrot.lane.b32.xlu0 %v533_v11, %s1886_s4  ;;  %v410_v12 = vpop.permute.xlu1 %409 }
 0x4d8   :  { %v2157_v15 = vmul.f32 %v410_v12, %v390_v49 }
 0x4da   :  { %v416_v16 = vsub.f32 %v2157_v15, %v414_v14 }
 0x4dc   :  { %v417_v17 = vmul.f32 %v416_v16, %v2128_v28 }
 0x4de   :  { %v419_v18 = vrot.slane %v417_v17, 2 }
 0x4e0   :  { %v421_v19 = vadd.f32 %v419_v18, %v2131_v31 }
 0x4e2   :  { %1512 = vmatmul.mubr.msk.f32.vlgmr.msra.gmra.mrb[2].mxu1 %vm65_vm0, %v421_v19  ;;  %v555_v63 = vrot.slane %v421_v19, 4 }
 0x4e3   :  { %1687 = vmatpush1.bf16.msra.mxu1 %v1976_v13  ;;  %781 = vmatprep.mubr.f32.mxu1 %v1885_v7 }
 0x4e4   :  { %1689 = vmatprep.subr.bf16.mxu1 %v1998_v22 }
 0x4e7   :  { %1691 = vmatpush1.bf16.msra.mxu1 %v2009_v26 }
 0x4e8   :  { %1693 = vmatprep.subr.bf16.mxu1 %v2030_v35 }
 0x4eb   :  { %1695 = vmatpush1.bf16.msra.mxu1 %v2042_v39 }
 0x4ec   :  { %1697 = vmatprep.subr.bf16.mxu1 %v2054_v44 }
 0x4ef   :  { %1699 = vmatpush1.bf16.msra.mxu1 %v2063_v48 }
 0x4f0   :  { %1717 = vmatprep.subr.bf16.mxu1 %v1965_v9 }
 0x549   :  { %v535_v49 = vpop.permute.xlu0 %534 }
 0x5b5   :  { %v501_v20 = vpop.f32.mrb[2].mxu1 }
 0x5b6   :  { %v503_v21 = vpop.f32.mrb[3].mxu1  ;;  %v508_v38 = vrot.slane %v501_v20, 4 }
 0x5b7   :  { %v509_v23 = vrot.slane %v503_v21, 4 }
 0x5b8   :  { %v512_v40 = vadd.f32 %v508_v38, %v2110_v10 }
 0x5b9   :  { %v513_v24 = vadd.f32 %v509_v23, %v2098_v58 }
 0x5ba   :  { %v1513_v41 = vmul.f32 -1.442695, %v512_v40 }
 0x5bb   :  { %v1514_v29 = vmul.f32 -1.442695, %v513_v24 }
 0x5bd   :  { %1801 = vpow2.f32 %v1514_v29 }
 0x5c7   :  { %v1802_v30 = vpop.eup %1801 }
 0x5c8   :  { %v521_v32 = vadd.f32 1.0, %v1802_v30 }
 0x5ca   :  { %1803 = vrcp.f32 %v521_v32 }
 0x5cb   :  { %1805 = vpow2.f32 %v1513_v41 }
 0x5d4   :  { %v1804_v33 = vpop.eup %1803 }
 0x5d5   :  { %v527_v34 = vmul.f32 2.0, %v1804_v33  ;;  %v1806_v42 = vpop.eup %1805 }
 0x5d6   :  { %v520_v43 = vadd.f32 1.0, %v1806_v42 }
 0x5d7   :  { %v1516_v36 = vadd.f32 -1.0, %v527_v34 }
 0x5d8   :  { %1807 = vrcp.f32 %v520_v43 }
 0x5d9   :  { %v531_v37 = vsel %vm171_vm1, %v1516_v36, %v1804_v33 }
 0x5da   :  { %539 = vrot.lane.b32.xlu1 %v531_v37, %s1886_s4 }
 0x5e2   :  { %v1808_v45 = vpop.eup %1807 }
 0x5e3   :  { %v537_v50 = vmul.f32 %v1808_v45, %v535_v49 }
 0x64c   :  { %v540_v46 = vpop.permute.xlu1 %539 }
 0x64d   :  { %v542_v47 = vmul.f32 %v1808_v45, %v540_v46 }
 0x64f   :  { %544 = vrot.lane.b32.xlu1 %v542_v47, %s1886_s4 }
 0x6c1   :  { %v545_v51 = vpop.permute.xlu1 %544 }
 0x6c2   :  { %v547_v52 = vadd.f32 %v545_v51, %v537_v50 }
 0x6c4   :  { %1809 = vtanh.f32 %v547_v52  ;;  %v563_v53 = vsub.f32 %v547_v52, %v535_v49 }
 0x6c6   :  { %565 = vrot.lane.b32.xlu1 %v563_v53, %s1886_s4 }
 0x6ce   :  { %v1810_v55 = vpop.eup %1809 }
 0x6cf   :  { %550 = vrot.lane.b32.xlu0 %v1810_v55, %s1886_s4 }
 0x738   :  { %v566_v56 = vpop.permute.xlu1 %565 }
 0x739   :  { %v568_v57 = vmul.f32 %v566_v56, %v2128_v28  ;;  %v2218_v56 = vadd.f32 %v2123_v27, %v2095_v54  ;;  %v2226_v54 = vadd.f32 %v2121_v25, %v2107_v8  ;;  %v2235_v25 = vld [vmem:[%s2409_s0 + $0x8] sm:$0xff] }
 0x73b   :  { %v570_v59 = vrot.slane %v568_v57, 4 }
 0x73d   :  { %v572_v60 = vadd.f32 %v570_v59, %v431_v6 }
 0x73f   :  { %v674_v61 = vrot.slane %v572_v60, 2 }
 0x741   :  { %675 = vrot.lane.b32.xlu1 %v674_v61, %s1886_s4  ;;  %v551_v62 = vpop.permute.xlu0 %550 }
 0x742   :  { %v2182_v0 = vmul.f32 %v551_v62, %v531_v37 }
 0x744   :  { %v557_v2 = vsub.f32 %v2182_v0, %v555_v63 }
 0x746   :  { %v558_v3 = vmul.f32 %v557_v2, %v2128_v28 }
 0x748   :  { %v560_v4 = vrot.slane %v558_v3, 4 }
 0x74a   :  { %v562_v5 = vadd.f32 %v560_v4, %v421_v19 }
 0x74c   :  { %1517 = vmatmul.mubr.msk.f32.vlgmr.msra.gmra.mrb[6].mxu0 %vm65_vm0, %v562_v5  ;;  %v696_v49 = vrot.slane %v562_v5, 2 }
 0x74d   :  { %1703 = vmatpush1.bf16.msra.mxu0 %v1976_v13  ;;  %907 = vmatprep.mubr.f32.mxu0 %v1885_v7 }
 0x74e   :  { %1705 = vmatprep.subr.bf16.mxu0 %v1998_v22 }
 0x751   :  { %1707 = vmatpush1.bf16.msra.mxu0 %v2009_v26 }
 0x752   :  { %1709 = vmatprep.subr.bf16.mxu0 %v2030_v35 }
 0x755   :  { %1711 = vmatpush1.bf16.msra.mxu0 %v2042_v39 }
 0x756   :  { %1713 = vmatprep.subr.bf16.mxu0 %v2054_v44 }
 0x759   :  { %1715 = vmatpush1.bf16.msra.mxu0 %v2063_v48 }
 0x75a   :  { %1733 = vmatprep.subr.bf16.mxu0 %v1965_v9 }
 0x7b3   :  { %v676_v36 = vpop.permute.xlu1 %675 }
 0x81f   :  { %v642_v6 = vpop.f32.mrb[6].mxu0 }
 0x820   :  { %v644_v11 = vpop.f32.mrb[7].mxu0  ;;  %v649_v24 = vrot.slane %v642_v6, 2 }
 0x821   :  { %v650_v12 = vrot.slane %v644_v11, 2 }
 0x822   :  { %v653_v9 = vadd.f32 %v649_v24, %v2110_v10 }
 0x823   :  { %v654_v14 = vadd.f32 %v650_v12, %v2098_v58 }
 0x824   :  { %v1518_v29 = vmul.f32 -1.442695, %v653_v9 }
 0x825   :  { %v1519_v16 = vmul.f32 -1.442695, %v654_v14 }
 0x827   :  { %1811 = vpow2.f32 %v1519_v16 }
 0x831   :  { %v1812_v17 = vpop.eup %1811 }
 0x832   :  { %v662_v18 = vadd.f32 1.0, %v1812_v17 }
 0x834   :  { %1813 = vrcp.f32 %v662_v18 }
 0x835   :  { %1815 = vpow2.f32 %v1518_v29 }
 0x83e   :  { %v1814_v19 = vpop.eup %1813 }
 0x83f   :  { %v668_v20 = vmul.f32 2.0, %v1814_v19  ;;  %v1816_v30 = vpop.eup %1815 }
 0x840   :  { %v661_v58 = vadd.f32 1.0, %v1816_v30 }
 0x841   :  { %v1521_v21 = vadd.f32 -1.0, %v668_v20 }
 0x842   :  { %1817 = vrcp.f32 %v661_v58 }
 0x843   :  { %v672_v23 = vsel %vm171_vm1, %v1521_v21, %v1814_v19 }
 0x844   :  { %680 = vrot.lane.b32.xlu0 %v672_v23, %s1886_s4 }
 0x84c   :  { %v1818_v32 = vpop.eup %1817 }
 0x84d   :  { %v678_v37 = vmul.f32 %v1818_v32, %v676_v36 }
 0x8b6   :  { %v681_v33 = vpop.permute.xlu0 %680 }
 0x8b7   :  { %v683_v34 = vmul.f32 %v1818_v32, %v681_v33 }
 0x8b9   :  { %685 = vrot.lane.b32.xlu0 %v683_v34, %s1886_s4 }
 0x92b   :  { %v686_v38 = vpop.permute.xlu0 %685 }
 0x92c   :  { %v688_v40 = vadd.f32 %v686_v38, %v678_v37 }
 0x92e   :  { %1819 = vtanh.f32 %v688_v40  ;;  %v704_v41 = vsub.f32 %v688_v40, %v676_v36 }
 0x930   :  { %706 = vrot.lane.b32.xlu0 %v704_v41, %s1886_s4 }
 0x938   :  { %v1820_v42 = vpop.eup %1819 }
 0x939   :  { %691 = vrot.lane.b32.xlu1 %v1820_v42, %s1886_s4 }
 0x9a2   :  { %v707_v10 = vpop.permute.xlu0 %706 }
 0x9a3   :  { %v709_v43 = vmul.f32 %v707_v10, %v2128_v28 }
 0x9a5   :  { %v711_v45 = vrot.slane %v709_v43, 6 }
 0x9a7   :  { %v713_v46 = vadd.f32 %v711_v45, %v572_v60 }
 0x9a9   :  { %809 = vrot.lane.b32.xlu0 %v713_v46, %s1886_s4 }
 0x9ab   :  { %v692_v47 = vpop.permute.xlu1 %691 }
 0x9ac   :  { %v694_v50 = vmul.f32 %v692_v47, %v672_v23 }
 0x9ae   :  { %v698_v51 = vsub.f32 %v694_v50, %v696_v49  ;;  %v695_v58 = vmul.f32 %v694_v50, %v2128_v28 }
 0x9b0   :  { %v699_v52 = vmul.f32 %v698_v51, %v2128_v28  ;;  %v1271_v34 = vrot.slane %v695_v58, 6 }
 0x9b2   :  { %v701_v53 = vrot.slane %v699_v52, 6 }
 0x9b4   :  { %v703_v55 = vadd.f32 %v701_v53, %v562_v5 }
 0x9b6   :  { %1522 = vmatmul.mubr.msk.f32.vlgmr.msra.gmra.mrb[4].mxu1 %vm65_vm0, %v703_v55 }
 0x9b7   :  { %1719 = vmatpush1.bf16.msra.mxu1 %v1976_v13  ;;  %1048 = vmatprep.mubr.f32.mxu1 %v1885_v7 }
 0x9b8   :  { %1721 = vmatprep.subr.bf16.mxu1 %v1998_v22 }
 0x9bb   :  { %1723 = vmatpush1.bf16.msra.mxu1 %v2009_v26 }
 0x9bc   :  { %1725 = vmatprep.subr.bf16.mxu1 %v2030_v35 }
 0x9bf   :  { %1727 = vmatpush1.bf16.msra.mxu1 %v2042_v39 }
 0x9c0   :  { %1729 = vmatprep.subr.bf16.mxu1 %v2054_v44 }
 0x9c3   :  { %1731 = vmatpush1.bf16.msra.mxu1 %v2063_v48 }
 0xa1b   :  { %v810_v18 = vpop.permute.xlu0 %809 }
 0xa89   :  { %v783_v57 = vpop.f32.mrb[4].mxu1 }
 0xa8a   :  { %v785_v59 = vpop.f32.mrb[5].mxu1  ;;  %v788_v27 = vadd.f32 %v783_v57, %v2226_v54 }
 0xa8b   :  { %v789_v60 = vadd.f32 %v785_v59, %v2218_v56 }
 0xa8c   :  { %v1523_v6 = vmul.f32 -1.442695, %v788_v27 }
 0xa8d   :  { %v1524_v61 = vmul.f32 -1.442695, %v789_v60 }
 0xa8f   :  { %1821 = vpow2.f32 %v1524_v61 }
 0xa99   :  { %v1822_v62 = vpop.eup %1821 }
 0xa9a   :  { %v797_v63 = vadd.f32 1.0, %v1822_v62 }
 0xa9c   :  { %1823 = vrcp.f32 %v797_v63 }
 0xa9d   :  { %1825 = vpow2.f32 %v1523_v6 }
 0xaa6   :  { %v1824_v2 = vpop.eup %1823 }
 0xaa7   :  { %v803_v3 = vmul.f32 2.0, %v1824_v2  ;;  %v1826_v11 = vpop.eup %1825 }
 0xaa8   :  { %v796_v12 = vadd.f32 1.0, %v1826_v11 }
 0xaa9   :  { %v1526_v4 = vadd.f32 -1.0, %v803_v3 }
 0xaaa   :  { %1827 = vrcp.f32 %v796_v12  ;;  %v554_v12 = vmul.f32 %v2182_v0, %v2128_v28 }
 0xaab   :  { %v807_v5 = vsel %vm171_vm1, %v1526_v4, %v1824_v2 }
 0xaac   :  { %814 = vrot.lane.b32.xlu1 %v807_v5, %s1886_s4 }
 0xab4   :  { %v1828_v14 = vpop.eup %1827 }
 0xab5   :  { %v812_v19 = vmul.f32 %v1828_v14, %v810_v18 }
 0xb1e   :  { %v815_v16 = vpop.permute.xlu1 %814 }
 0xb1f   :  { %v817_v17 = vmul.f32 %v1828_v14, %v815_v16 }
 0xb21   :  { %819 = vrot.lane.b32.xlu1 %v817_v17, %s1886_s4 }
 0xb93   :  { %v820_v20 = vpop.permute.xlu1 %819 }
 0xb94   :  { %v822_v21 = vadd.f32 %v820_v20, %v812_v19 }
 0xb96   :  { %1829 = vtanh.f32 %v822_v21  ;;  %v833_v23 = vsub.f32 %v822_v21, %v810_v18  ;;  %v1275_v18 = vrot.slane %v554_v12, 2 }
 0xb98   :  { %835 = vrot.lane.b32.xlu1 %v833_v23, %s1886_s4 }
 0xba0   :  { %v1830_v8 = vpop.eup %1829 }
 0xba1   :  { %825 = vrot.lane.b32.xlu0 %v1830_v8, %s1886_s4 }
 0xc0a   :  { %v836_v24 = vpop.permute.xlu1 %835 }
 0xc0b   :  { %v838_v9 = vmul.f32 %v836_v24, %v2235_v25 }
 0xc0d   :  { %v839_v29 = vadd.f32 %v838_v9, %v713_v46 }
 0xc0f   :  { %v941_v30 = vrot.slane %v839_v29, 6 }
 0xc11   :  { %942 = vrot.lane.b32.xlu1 %v941_v30, %s1886_s4 }
 0xc13   :  { %v826_v32 = vpop.permute.xlu0 %825 }
 0xc14   :  { %v828_v33 = vmul.f32 %v826_v32, %v807_v5 }
 0xc16   :  { %v829_v36 = vmul.f32 %v828_v33, %v2235_v25  ;;  %v830_v37 = vsub.f32 %v828_v33, %v703_v55 }
 0xc18   :  { %v831_v38 = vmul.f32 %v830_v37, %v2235_v25  ;;  %v1267_v40 = vrot.slane %v829_v36, 2  ;;  %v2243_v41 = vsel %vm1256_vm2, %v829_v36, %v1271_v34 }
 0xc1a   :  { %v2245_v42 = vadd.f32 %v831_v38, %v703_v55  ;;  %v2248_v10 = vsel %vm1256_vm2, %v695_v58, %v1267_v40 }
 0xc1c   :  { %1527 = vmatmul.mubr.msk.f32.vlgmr.msra.gmra.mrb[8].mxu0 %vm65_vm0, %v2245_v42  ;;  %v963_v16 = vrot.slane %v2245_v42, 6 }
 0xc1d   :  { %1735 = vmatpush1.bf16.msra.mxu0 %v1976_v13  ;;  %1189 = vmatprep.mubr.f32.mxu0 %v1885_v7 }
 0xc1e   :  { %1737 = vmatprep.subr.bf16.mxu0 %v1998_v22 }
 0xc21   :  { %1739 = vmatpush1.bf16.msra.mxu0 %v2009_v26 }
 0xc22   :  { %1741 = vmatprep.subr.bf16.mxu0 %v2030_v35 }
 0xc25   :  { %1743 = vmatpush1.bf16.msra.mxu0 %v2042_v39 }
 0xc26   :  { %1745 = vmatprep.subr.bf16.mxu0 %v2054_v44 }
 0xc29   :  { %1747 = vmatpush1.bf16.msra.mxu0 %v2063_v48 }
 0xc83   :  { %v943_v60 = vpop.permute.xlu1 %942 }
 0xcef   :  { %v909_v43 = vpop.f32.mrb[8].mxu0 }
 0xcf0   :  { %v911_v45 = vpop.f32.mrb[9].mxu0  ;;  %v916_v39 = vrot.slane %v909_v43, 6 }
 0xcf1   :  { %v917_v46 = vrot.slane %v911_v45, 6 }
 0xcf2   :  { %v920_v44 = vadd.f32 %v916_v39, %v2226_v54 }
 0xcf3   :  { %v921_v47 = vadd.f32 %v917_v46, %v2218_v56 }
 0xcf4   :  { %v1528_v48 = vmul.f32 -1.442695, %v920_v44 }
 0xcf5   :  { %v1529_v13 = vmul.f32 -1.442695, %v921_v47 }
 0xcf7   :  { %1831 = vpow2.f32 %v1529_v13 }
 0xd01   :  { %v1832_v49 = vpop.eup %1831 }
 0xd02   :  { %v929_v50 = vadd.f32 1.0, %v1832_v49 }
 0xd04   :  { %1833 = vrcp.f32 %v929_v50 }
 0xd05   :  { %1835 = vpow2.f32 %v1528_v48 }
 0xd0e   :  { %v1834_v22 = vpop.eup %1833 }
 0xd0f   :  { %v935_v26 = vmul.f32 2.0, %v1834_v22  ;;  %v1836_v52 = vpop.eup %1835 }
 0xd10   :  { %v928_v53 = vadd.f32 1.0, %v1836_v52 }
 0xd11   :  { %v1531_v51 = vadd.f32 -1.0, %v935_v26 }
 0xd12   :  { %1837 = vrcp.f32 %v928_v53 }
 0xd13   :  { %v939_v35 = vsel %vm171_vm1, %v1531_v51, %v1834_v22 }
 0xd14   :  { %947 = vrot.lane.b32.xlu0 %v939_v35, %s1886_s4 }
 0xd1c   :  { %v1838_v55 = vpop.eup %1837 }
 0xd1d   :  { %v945_v61 = vmul.f32 %v1838_v55, %v943_v60 }
 0xd86   :  { %v948_v57 = vpop.permute.xlu0 %947 }
 0xd87   :  { %v950_v59 = vmul.f32 %v1838_v55, %v948_v57 }
 0xd89   :  { %952 = vrot.lane.b32.xlu0 %v950_v59, %s1886_s4 }
 0xdfb   :  { %v953_v62 = vpop.permute.xlu0 %952 }
 0xdfc   :  { %v955_v63 = vadd.f32 %v953_v62, %v945_v61 }
 0xdfe   :  { %1839 = vtanh.f32 %v955_v63  ;;  %v971_v2 = vsub.f32 %v955_v63, %v943_v60  ;;  %v413_v60 = vmul.f32 %v2157_v15, %v2128_v28 }
 0xe00   :  { %973 = vrot.lane.b32.xlu0 %v971_v2, %s1886_s4  ;;  %v1279_v2 = vrot.slane %v413_v60, 6 }
 0xe08   :  { %v1840_v3 = vpop.eup %1839 }
 0xe09   :  { %958 = vrot.lane.b32.xlu1 %v1840_v3, %s1886_s4 }
 0xe72   :  { %v974_v4 = vpop.permute.xlu0 %973 }
 0xe73   :  { %v976_v5 = vmul.f32 %v974_v4, %v2235_v25 }
 0xe75   :  { %v978_v27 = vrot.slane %v976_v5, 2 }
 0xe77   :  { %v980_v6 = vadd.f32 %v978_v27, %v839_v29 }
 0xe79   :  { %v1082_v11 = vrot.slane %v980_v6, 4 }
 0xe7b   :  { %1083 = vrot.lane.b32.xlu0 %v1082_v11, %s1886_s4  ;;  %v959_v14 = vpop.permute.xlu1 %958 }
 0xe7c   :  { %v961_v17 = vmul.f32 %v959_v14, %v939_v35 }
 0xe7e   :  { %v962_v19 = vmul.f32 %v961_v17, %v2235_v25  ;;  %v965_v20 = vsub.f32 %v961_v17, %v963_v16 }
 0xe80   :  { %v966_v21 = vmul.f32 %v965_v20, %v2235_v25  ;;  %v1263_v23 = vrot.slane %v962_v19, 6  ;;  %v1277_v8 = vsel %vm1256_vm2, %v962_v19, %v1275_v18 }
 0xe81   :  { %v1292_v24 = vsel %vm1286_vm3, %v2243_v41, %v1277_v8 }
 0xe82   :  { %v968_v0 = vrot.slane %v966_v21, 2  ;;  %v2279_v9 = vsel %vm1256_vm2, %v554_v12, %v1263_v23 }
 0xe84   :  { %v970_v29 = vadd.f32 %v968_v0, %v2245_v42 }
 0xe86   :  { %1532 = vmatmul.mubr.msk.f32.vlgmr.msra.gmra.mrb[6].mxu1 %vm65_vm0, %v970_v29  ;;  %v1104_v62 = vrot.slane %v970_v29, 4 }
 0xeed   :  { %v1084_v26 = vpop.permute.xlu0 %1083 }
 0xf59   :  { %v1050_v30 = vpop.f32.mrb[6].mxu1 }
 0xf5a   :  { %v1052_v58 = vpop.f32.mrb[7].mxu1  ;;  %v1057_v42 = vrot.slane %v1050_v30, 4 }
 0xf5b   :  { %v1058_v32 = vrot.slane %v1052_v58, 4 }
 0xf5c   :  { %v1061_v45 = vadd.f32 %v1057_v42, %v2226_v54  ;;  %v1298_v42 = vld [vmem:[%s2414_s5 + $0x18] sm:$0xff] }
 0xf5d   :  { %v1062_v33 = vadd.f32 %v1058_v32, %v2218_v56 }
 0xf5e   :  { %v1533_v46 = vmul.f32 -1.442695, %v1061_v45 }
 0xf5f   :  { %v1534_v34 = vmul.f32 -1.442695, %v1062_v33 }
 0xf61   :  { %1841 = vpow2.f32 %v1534_v34 }
 0xf6b   :  { %v1842_v36 = vpop.eup %1841 }
 0xf6c   :  { %v1070_v37 = vadd.f32 1.0, %v1842_v36 }
 0xf6e   :  { %1843 = vrcp.f32 %v1070_v37  ;;  %v1296_v37 = vld [vmem:[%s2414_s5 + $0x8] sm:$0xff] }
 0xf6f   :  { %1845 = vpow2.f32 %v1533_v46 }
 0xf78   :  { %v1844_v38 = vpop.eup %1843 }
 0xf79   :  { %v1076_v40 = vmul.f32 2.0, %v1844_v38  ;;  %v1846_v47 = vpop.eup %1845 }
 0xf7a   :  { %v1069_v13 = vadd.f32 1.0, %v1846_v47  ;;  %v1395_v47 = vld [vmem:[%s2416_s7 + $0x10] sm:$0xff] }
 0xf7b   :  { %v1536_v41 = vadd.f32 -1.0, %v1076_v40  ;;  %v1748_v40 = vpack.c.bf16 %v1296_v37, %v1295_v1 }
 0xf7c   :  { %1847 = vrcp.f32 %v1069_v13  ;;  %v1396_v13 = vld [vmem:[%s2416_s7 + $0x18] sm:$0xff] }
 0xf7d   :  { %v1080_v43 = vsel %vm171_vm1, %v1536_v41, %v1844_v38  ;;  %v1887_v38 = vmov 0.0|0.0   ;;  %v1394_v41 = vld [vmem:[%s2416_s7 + $0x8] sm:$0xff]  ;;  %1749 = vmatprep.subr.bf16.mxu1 %v1748_v40 }
 0xf7e   :  { %1088 = vrot.lane.b32.xlu1 %v1080_v43, %s1886_s4  ;;  %1764 = vmatprep.subr.bf16.mxu0 %v1887_v38 }
 0xf7f   :  { %1751 = vmatpush3.bf16.msra.mxu1 %v1748_v40 }
 0xf86   :  { %v1848_v49 = vpop.eup %1847 }
 0xf87   :  { %v1086_v51 = vmul.f32 %v1848_v49, %v1084_v26 }
 0xff0   :  { %v1089_v50 = vpop.permute.xlu1 %1088 }
 0xff1   :  { %v1091_v22 = vmul.f32 %v1848_v49, %v1089_v50  ;;  %v1768_v49 = vpack.c.bf16 %v1396_v13, %v1395_v47 }
 0xff3   :  { %1093 = vrot.lane.b32.xlu1 %v1091_v22, %s1886_s4 }
0x1065   :  { %v1094_v35 = vpop.permute.xlu1 %1093 }
0x1066   :  { %v1096_v39 = vadd.f32 %v1094_v35, %v1086_v51  ;;  %v1299_v35 = vld [vmem:[%s2414_s5 + $0x20] sm:$0xff] }
0x1068   :  { %1849 = vtanh.f32 %v1096_v39  ;;  %v1112_v44 = vsub.f32 %v1096_v39, %v1084_v26  ;;  %v1300_v39 = vld [vmem:[%s2414_s5 + $0x28] sm:$0xff] }
0x106a   :  { %1114 = vrot.lane.b32.xlu1 %v1112_v44, %s1886_s4  ;;  %v1397_v44 = vld [vmem:[%s2416_s7 + $0x20] sm:$0xff] }
0x1072   :  { %v1850_v48 = vpop.eup %1849 }
0x1073   :  { %1099 = vrot.lane.b32.xlu0 %v1850_v48, %s1886_s4  ;;  %v1756_v48 = vpack.c.bf16 %v1300_v39, %v1299_v35 }
0x10dc   :  { %v1115_v52 = vpop.permute.xlu1 %1114 }
0x10dd   :  { %v1117_v53 = vmul.f32 %v1115_v52, %v2235_v25  ;;  %v1398_v52 = vld [vmem:[%s2416_s7 + $0x28] sm:$0xff] }
0x10df   :  { %v1119_v55 = vrot.slane %v1117_v53, 4  ;;  %v1771_v53 = vpack.c.bf16 %v1398_v52, %v1397_v44 }
0x10e1   :  { %v1121_v57 = vadd.f32 %v1119_v55, %v980_v6  ;;  %v1301_v55 = vld [vmem:[%s2414_s5 + $0x30] sm:$0xff] }
0x10e3   :  { %v1223_v59 = vrot.slane %v1121_v57, 2  ;;  %v1302_v57 = vld [vmem:[%s2414_s5 + $0x38] sm:$0xff] }
0x10e5   :  { %1224 = vrot.lane.b32.xlu1 %v1223_v59, %s1886_s4  ;;  %v1100_v61 = vpop.permute.xlu0 %1099  ;;  %v1399_v59 = vld [vmem:[%s2416_s7 + $0x30] sm:$0xff] }
0x10e6   :  { %v1102_v63 = vmul.f32 %v1100_v61, %v1080_v43  ;;  %v1297_v43 = vld [vmem:[%s2414_s5 + $0x10] sm:$0xff]  ;;  %v1400_v61 = vld [vmem:[%s2416_s7 + $0x38] sm:$0xff] }
0x10e7   :  { %v1752_v46 = vpack.c.bf16 %v1298_v42, %v1297_v43 }
0x10e8   :  { %v1103_v3 = vmul.f32 %v1102_v63, %v2235_v25  ;;  %v1106_v4 = vsub.f32 %v1102_v63, %v1104_v62  ;;  %v1774_v62 = vpack.c.bf16 %v1400_v61, %v1399_v59 }
0x10e9   :  { %1753 = vmatprep.subr.bf16.mxu1 %v1752_v46 }
0x10ea   :  { %v1107_v5 = vmul.f32 %v1106_v4, %v2235_v25  ;;  %v1259_v27 = vrot.slane %v1103_v3, 2  ;;  %v1281_v11 = vsel %vm1256_vm2, %v1103_v3, %v1279_v2  ;;  %1755 = vmatpush3.bf16.msra.mxu1 %v1752_v46 }
0x10eb   :  { %v2299_v6 = vsel %vm1288_vm4, %v1292_v24, %v1281_v11  ;;  %1757 = vmatprep.subr.bf16.mxu1 %v1756_v48 }
0x10ec   :  { %v1109_v12 = vrot.slane %v1107_v5, 4  ;;  %v2302_v28 = vsel %vm1256_vm2, %v413_v60, %v1259_v27  ;;  %v1760_v60 = vpack.c.bf16 %v1302_v57, %v1301_v55 }
0x10ee   :  { %v2304_v15 = vadd.f32 %v1109_v12, %v970_v29  ;;  %1759 = vmatpush3.bf16.msra.mxu1 %v1756_v48 }
0x10ef   :  { %1761 = vmatprep.subr.bf16.mxu1 %v1760_v60 }
0x10f0   :  { %1537 = vmatmul.mubr.msk.f32.vlgmr.msra.gmra.mrb[10].mxu0 %vm65_vm0, %v2304_v15  ;;  %v1245_v3 = vrot.slane %v2304_v15, 2 }
0x10f1   :  { %1601 = vmatprep.mubr.msk.f32.mxu0 %vm1888_vm5, %v1885_v7 }
0x10f2   :  { %1763 = vmatpush3.bf16.msra.mxu1 %v1760_v60 }
0x1157   :  { %v1225_v50 = vpop.permute.xlu1 %1224 }
0x11c3   :  { %v1191_v14 = vpop.f32.mrb[10].mxu0 }
0x11c4   :  { %v1193_v16 = vpop.f32.mrb[11].mxu0  ;;  %v1198_v29 = vrot.slane %v1191_v14, 2  ;;  %v1283_v14 = vrot.slane %v2131_v31, 2 }
0x11c5   :  { %v1199_v17 = vrot.slane %v1193_v16, 2 }
0x11c6   :  { %v1202_v30 = vadd.f32 %v1198_v29, %v2226_v54  ;;  %v1393_v54 = vld [vmem:[%s2416_s7] sm:$0xff] }
0x11c7   :  { %v1203_v18 = vadd.f32 %v1199_v17, %v2218_v56  ;;  %v1765_v45 = vpack.c.bf16 %v1394_v41, %v1393_v54 }
0x11c8   :  { %v1538_v58 = vmul.f32 -1.442695, %v1202_v30 }
0x11c9   :  { %v1539_v19 = vmul.f32 -1.442695, %v1203_v18  ;;  %1766 = vmatpush3.bf16.msra.mxu0 %v1765_v45 }
0x11ca   :  { %1767 = vmatprep.subr.bf16.mxu0 %v1887_v38 }
0x11cb   :  { %1851 = vpow2.f32 %v1539_v19 }
0x11cd   :  { %1769 = vmatpush3.bf16.msra.mxu0 %v1768_v49 }
0x11ce   :  { %1770 = vmatprep.subr.bf16.mxu0 %v1887_v38 }
0x11d1   :  { %1772 = vmatpush3.bf16.msra.mxu0 %v1771_v53 }
0x11d2   :  { %1773 = vmatprep.subr.bf16.mxu0 %v1887_v38 }
0x11d5   :  { %v1852_v20 = vpop.eup %1851  ;;  %1775 = vmatpush3.bf16.msra.mxu0 %v1774_v62 }
0x11d6   :  { %v1211_v21 = vadd.f32 1.0, %v1852_v20 }
0x11d8   :  { %1853 = vrcp.f32 %v1211_v21 }
0x11d9   :  { %1855 = vpow2.f32 %v1538_v58 }
0x11e2   :  { %v1854_v23 = vpop.eup %1853 }
0x11e3   :  { %v1217_v8 = vmul.f32 2.0, %v1854_v23  ;;  %v1856_v56 = vpop.eup %1855 }
0x11e4   :  { %v1210_v32 = vadd.f32 1.0, %v1856_v56 }
0x11e5   :  { %v1541_v24 = vadd.f32 -1.0, %v1217_v8 }
0x11e6   :  { %1857 = vrcp.f32 %v1210_v32 }
0x11e7   :  { %v2311_v0 = vsel %vm171_vm1, %v1541_v24, %v1854_v23 }
0x11e8   :  { %1229 = vrot.lane.b32.xlu0 %v2311_v0, %s1886_s4 }
0x11f0   :  { %v1858_v33 = vpop.eup %1857 }
0x11f1   :  { %v1227_v22 = vmul.f32 %v1858_v33, %v1225_v50 }
0x125a   :  { %v1230_v34 = vpop.permute.xlu0 %1229 }
0x125b   :  { %v1232_v36 = vmul.f32 %v1858_v33, %v1230_v34 }
0x125d   :  { %1234 = vrot.lane.b32.xlu0 %v1232_v36, %s1886_s4 }
0x12cf   :  { %v1235_v26 = vpop.permute.xlu0 %1234 }
0x12d0   :  { %v1237_v51 = vadd.f32 %v1235_v26, %v1227_v22 }
0x12d2   :  { %1859 = vtanh.f32 %v1237_v51 }
0x12dc   :  { %v1860_v63 = vpop.eup %1859 }
0x12dd   :  { %1240 = vrot.lane.b32.xlu1 %v1860_v63, %s1886_s4  ;;  %s1889_s4 = smov [#allocation2]  }
0x12de   :  { %s1491_s11 = sshll.u32 %s1889_s4, 4  ;;  %s1492_s11 = int_to_ptr.vmem [resolvable:$true] %s1491_s11 }
0x12df   :  { %p1866_p1 = scmp.lt.s32.totalorder %s1492_s11, %s1492_s11 }
0x134f   :  { %v1241_v2 = vpop.permute.xlu1 %1240 }
0x1350   :  { %v1243_v4 = vmul.f32 %v1241_v2, %v2311_v0 }
0x1352   :  { %v1244_v5 = vmul.f32 %v1243_v4, %v2235_v25  ;;  %v1247_v27 = vsub.f32 %v1243_v4, %v1245_v3 }
0x1354   :  { %v1248_v11 = vmul.f32 %v1247_v27, %v2235_v25  ;;  %v1254_v12 = vrot.slane %v1244_v5, 6  ;;  %v1285_v17 = vsel %vm1256_vm2, %v1244_v5, %v1283_v14 }
0x1355   :  { %v1294_v21 = vsel %vm1290_vm6, %v2299_v6, %v1285_v17 }
0x1356   :  { %v1250_v16 = vrot.slane %v1248_v11, 6  ;;  %v1257_v7 = vsel %vm1256_vm2, %v2131_v31, %v1254_v12  ;;  %v1545_v31 = vld [vmem:[%s2417_s8] ss:$0 sm:$0xff]  ;;  %s1861_s8 = scalar_lea.vmem %s1492_s11, 32 }
0x1357   :  { %v1287_v18 = vsel %vm1286_vm3, %v1257_v7, %v2302_v28  ;;  %p1862_p0 = scmp.ne.s32.totalorder %s1492_s11, %s1861_s8  ;;  %p1867_p2 = scmp.lt.s32.totalorder %s1861_s8, %s1861_s8 }
0x1358   :  { %v1252_v19 = vadd.f32 %v1250_v16, %v2304_v15  ;;  %v1289_v20 = vsel %vm1288_vm4, %v1287_v18, %v2279_v9  ;;  %v1542_v9 = vld [vmem:[%s2415_s6] ss:$0 sm:$0xff] }
0x1359   :  { %v1291_v25 = vsel %vm1290_vm6, %v1289_v20, %v2248_v10  ;;  %p1868_p3 = por %p1867_p2, %p1866_p1 }
0x135a   :  { %1582 = vmatprep.mubr.msk.f32.mxu1 %vm65_vm0, %v1291_v25  ;;  %1602 = vmatmul.mubr.msk.f32.vlgmr.msra.gmra.mrb[12].mxu0 %vm65_vm0, %v1252_v19 }
0x135b   :  { %1583 = vmatmul.mubr.msk.f32.vlgmr.msra.gmra.mrb[8].mxu1 %vm65_vm0, %v1294_v21  ;;  %p1869_p4 = pnand %p1868_p3, %p1862_p0 }
0x142d   :  { %v1477_v28 = vpop.f32.mrb[12].mxu0 }
0x142e   :  { %v1478_v10 = vadd.f32 %v1545_v31, %v1477_v28  ;;  %v1584_v15 = vpop.f32.mrb[8].mxu1  ;;  %v1603_v23 = vpop.f32.mrb[13].mxu0 }
0x142f   :  { %v1388_v8 = vadd.f32 %v1584_v15, %v1542_v9  ;;  %v1382_v6 = vpop.f32.mrb[9].mxu1 }
0x1430   :  { %v1383_v24 = vadd.f32 %v1542_v9, %v1382_v6  ;;  %1482 = vst.msk [vmem:[#allocation2] sm:$0x3] %vm1481_vm7, %v1478_v10 }
0x1431   :  { %1392 = vst [vmem:[%s2418_s9 + $0x8] sm:$0xff] %v1388_v8 }
0x1432   :  { %1872 = shalt.err (!%p1869_p4)
}
0x1433   :  { %s1873_s2 = scalar_lea.hbm %s2419_s10, 32 }
0x1434   :  { %p1874_p5 = scmp.ne.s32.totalorder %s2419_s10, %s1873_s2  ;;  %p1877_p6 = scmp.lt.u32.totalorder %s1873_s2, %s2419_s10 }
0x1436   :  { %p1879_p7 = pnand %p1877_p6, %p1874_p5 }
0x1438   :  { %1882 = shalt.err (!%p1879_p7)
}
0x1439   :  { %1494 = dma.vmem_to_hbm [thread:$0]  %s1492_s11, 32, %s2419_s10, [#allocation3]   ;;  %1391 = vst [vmem:[%s2418_s9] sm:$0xff] %v1383_v24 }
0x143a   :  { %1883 = dma.done.wait [#allocation3], 32  }
0x143b   :  { %1884 = vsyncadd [#allocation3], 4294967264 }
0x143c   :  { %1500 = vsyncpa [#allocation3], 1 }

</bundles_post_ra>
